<compile_context>
chip_gen: v7x
topology: tpu7x:2x2x1
jax: 0.10.0
libtpu: 0.0.40
codegen_flags: <defaults>
</compile_context>

<pallas_src>
import functools

import jax
import jax.numpy as jnp
import numpy as np
from jax.experimental import pallas as pl
from jax.experimental.pallas import tpu as pltpu


def _round_up(x, m):
    return ((x + m - 1) // m) * m


def _rnn_kernel(x_ref, noise_ref, wi_a_ref, wrec_ta_ref, wo_ref, h0_ref,
                out_ref, h_c, r_c, buf_ref, *, noise_std, one_minus_alpha,
                bp, ts, unroll):
    """One grid step = one time tile of TS steps over the whole (padded) batch.

    x_ref:       (TS*BP, I)   time-major-flattened input tile
    noise_ref:   (TS*BP, H)   pre-generated standard-normal noise tile
    wi_a_ref:    (I, H)       alpha * wi * si[:, None]
    wrec_ta_ref: (H, H)       alpha * wrec.T
    wo_ref:      (H, O)       wo * so[None, :]
    h0_ref:      (1, H)       initial hidden state
    out_ref:     (TS*BP, O)   output tile (time-major-flattened)
    h_c, r_c:    (BP, H)      hidden state / rate carried across time tiles
    buf_ref:     (TS*BP, H)   shared scratch: drive on entry, rates on exit
    """
    H = wrec_ta_ref.shape[0]
    hp = jax.lax.Precision.HIGHEST  # see header: keeps f32 accuracy

    # (Re)initialize carried state at the start of the sequence.
    @pl.when(pl.program_id(0) == 0)
    def _init():
        h0b = jnp.broadcast_to(h0_ref[...], (bp, H))
        h_c[...] = h0b
        r_c[...] = jnp.tanh(h0b)

    # ---- hoisted input projection: ONE 2-D GEMM for the whole tile ---------
    # drive = noise_std*noise + x @ (alpha*wi_full); computed off the serial
    # critical path.  noise is streamed un-prescaled (anti-pattern otherwise);
    # the single fused mul/add here is outside the recurrence chain.
    inp = jnp.dot(x_ref[...], wi_a_ref[...],
                  preferred_element_type=jnp.float32, precision=hp)
    buf_ref[...] = noise_std * noise_ref[...] + inp            # (TS*BP, H)

    # ---- serial recurrence: only the irreducible r @ (alpha*wrec.T) --------
    wrec_ta = wrec_ta_ref[...]

    def step(j, carry):
        h, r = carry
        off = pl.multiple_of(j * bp, bp)                       # 8-aligned (bp%8==0)
        rec = jnp.dot(r, wrec_ta, preferred_element_type=jnp.float32,
                      precision=hp)
        h_new = one_minus_alpha * h + buf_ref[pl.ds(off, bp), :] + rec
        r_new = jnp.tanh(h_new)
        buf_ref[pl.ds(off, bp), :] = r_new                     # reuse drive slot
        return (h_new, r_new)

    h_fin, r_fin = jax.lax.fori_loop(0, ts, step, (h_c[...], r_c[...]),
                                     unroll=unroll)
    h_c[...] = h_fin
    r_c[...] = r_fin

    # ---- deferred output projection: ONE 2-D GEMM + one dense store --------
    out_ref[...] = jnp.dot(buf_ref[...], wo_ref[...],
                           preferred_element_type=jnp.float32,
                           precision=hp).astype(out_ref.dtype)


def rnn_forward(x, noise_tm, wi, si, wrec, wo, so, h0, *, noise_std, alpha,
                vmem_budget_bytes=16 * 1024 * 1024):
    """x: (B, S, I) batch-major (module layout); noise_tm: (S, B, H) time-major
    standard-normal noise (module-internal randomness, generated in the layout
    the kernel streams -> no HBM transpose).  Returns (B, S, O)."""
    B, S, I = x.shape
    H = wrec.shape[0]
    O = wo.shape[1]

    # Proxy parameters (RNN._define_proxy_parameters) with alpha folded in.
    wi_a = (alpha * (wi * si[:, None])).astype(jnp.float32)     # (I, H)
    wrec_ta = (alpha * jnp.transpose(wrec)).astype(jnp.float32)  # (H, H)
    wo_full = (wo * so[None, :]).astype(jnp.float32)            # (H, O)
    h0_2d = h0.reshape(1, H).astype(jnp.float32)

    # Pad batch to a multiple of 8 sublanes: makes every reshape a free
    # sublane-tile merge and every per-step slice start 8-aligned.
    Bp = _round_up(max(B, 8), 8)

    # Time tile from an explicit VMEM working-set budget:
    #   2x double-buffered streams (x, noise, out) + 1x shared drive/rate scratch.
    bytes_per_t = Bp * 4 * (2 * I + 2 * H + 2 * O + H)
    TS = int(max(1, min(S, vmem_budget_bytes // bytes_per_t, 2048)))
    S_pad = _round_up(S, TS)
    NT = S_pad // TS

    # Time-major, batch-padded, flattened 2-D streams.
    x_tm = jnp.transpose(x, (1, 0, 2)).astype(jnp.float32)       # tiny (I small)
    x_tm = jnp.pad(x_tm, ((0, S_pad - S), (0, Bp - B), (0, 0)))
    x2d = x_tm.reshape(S_pad * Bp, I)

    n_tm = jnp.pad(noise_tm.astype(jnp.float32),
                   ((0, S_pad - S), (0, Bp - B), (0, 0)))
    n2d = n_tm.reshape(S_pad * Bp, H)

    # Short, fixed serial loop: expose it to the scheduler.
    unroll = True if TS <= 32 else 8

    kernel = functools.partial(
        _rnn_kernel, noise_std=float(noise_std),
        one_minus_alpha=float(1.0 - alpha), bp=Bp, ts=TS, unroll=unroll)

    grid_spec = pltpu.PrefetchScalarGridSpec(
        num_scalar_prefetch=0,
        grid=(NT,),
        in_specs=[
            pl.BlockSpec((TS * Bp, I), lambda t: (t, 0)),   # x (time-major flat)
            pl.BlockSpec((TS * Bp, H), lambda t: (t, 0)),   # noise
            pl.BlockSpec((I, H), lambda t: (0, 0)),         # alpha*wi_full
            pl.BlockSpec((H, H), lambda t: (0, 0)),         # alpha*wrec.T
            pl.BlockSpec((H, O), lambda t: (0, 0)),         # wo_full
            pl.BlockSpec((1, H), lambda t: (0, 0)),         # h0
        ],
        out_specs=pl.BlockSpec((TS * Bp, O), lambda t: (t, 0)),
        scratch_shapes=[
            pltpu.VMEM((Bp, H), jnp.float32),        # carried h
            pltpu.VMEM((Bp, H), jnp.float32),        # carried r = tanh(h)
            pltpu.VMEM((TS * Bp, H), jnp.float32),   # shared drive / rates
        ],
    )

    # Scoped-VMEM limit: comfortably above the estimate, below v7x's 64 MiB.
    est = 4 * (2 * TS * Bp * (I + H + O) + TS * Bp * H + 2 * Bp * H
               + I * H + H * H + H * O + H)
    vmem_limit = int(min(56 * 2**20, max(32 * 2**20, est * 3 // 2)))

    out2d = pl.pallas_call(
        kernel,
        out_shape=jax.ShapeDtypeStruct((S_pad * Bp, O), jnp.float32),
        grid_spec=grid_spec,
        compiler_params=pltpu.CompilerParams(
            dimension_semantics=("arbitrary",),
            vmem_limit_bytes=vmem_limit),
    )(x2d, n2d, wi_a, wrec_ta, wo_full, h0_2d)

    out = out2d.reshape(S_pad, Bp, O)[:S, :B]                    # drop padding
    return jnp.transpose(out, (1, 0, 2))                         # (B, S, O)


def rnn_reference(x, noise_tm, wi, si, wrec, wo, so, h0, *, noise_std, alpha):
    """Pure-JAX replica of the PyTorch forward loop (correctness oracle)."""
    B, S, _ = x.shape
    H = wrec.shape[0]
    hp = jax.lax.Precision.HIGHEST
    wi_full = wi * si[:, None]
    wo_full = wo * so[None, :]
    h = jnp.broadcast_to(h0, (B, H)).astype(jnp.float32)
    r = jnp.tanh(h)
    outs = []
    for i in range(S):
        h = h + noise_std * noise_tm[i] + alpha * (
            -h + jnp.dot(r, wrec.T, precision=hp)
            + jnp.dot(x[:, i, :], wi_full, precision=hp))
        r = jnp.tanh(h)
        outs.append(jnp.dot(r, wo_full, precision=hp))
    return jnp.stack(outs, axis=1)


if __name__ == "__main__":
    # Small shapes consistent with the module's forward signature.
    batch, seq, input_size, hidden_size, output_size = 2, 8, 4, 32, 2
    noise_std, alpha, rho = 0.05, 0.2, 1.0

    key = jax.random.PRNGKey(0)
    k_x, k_n, k_wi, k_wrec, k_wo, k_h0 = jax.random.split(key, 6)

    # Deterministic parameter init mirroring RNN.__init__ defaults.
    wi = jax.random.normal(k_wi, (input_size, hidden_size), jnp.float32)
    si = jnp.ones((input_size,), jnp.float32)
    wrec = jax.random.normal(k_wrec, (hidden_size, hidden_size),
                             jnp.float32) * (rho / jnp.sqrt(hidden_size))
    wo = jax.random.normal(k_wo, (hidden_size, output_size),
                           jnp.float32) * (1.0 / hidden_size)
    so = jnp.ones((output_size,), jnp.float32)
    h0 = 0.1 * jax.random.normal(k_h0, (hidden_size,), jnp.float32)

    x = jax.random.normal(k_x, (batch, seq, input_size), jnp.float32)
    # TODO(synk): torch.randn noise has no bit-exact Pallas equivalent; it is
    # generated deterministically in JAX (directly time-major, so no HBM
    # transpose) and streamed in.  It could instead be drawn in-kernel with
    # pltpu.prng_seed/stateful_normal to remove the HBM read entirely, at the
    # cost of exact comparison against the reference.
    noise_tm = jax.random.normal(k_n, (seq, batch, hidden_size), jnp.float32)

    out = rnn_forward(x, noise_tm, wi, si, wrec, wo, so, h0,
                      noise_std=noise_std, alpha=alpha)
    out = jax.block_until_ready(out)

    ref = rnn_reference(x, noise_tm, wi, si, wrec, wo, so, h0,
                        noise_std=noise_std, alpha=alpha)
    np.testing.assert_allclose(np.asarray(out), np.asarray(ref),
                               rtol=1e-4, atol=1e-4)

    assert out.shape == (batch, seq, output_size)
    print("KERNEL_OK")
</pallas_src>

<mosaic_0001>
module attributes {stable_mosaic.version = 11 : i64} {
  func.func @_rnn_kernel(%arg0: i32, %arg1: memref<64x4xf32, #tpu.memory_space<vmem>>, %arg2: memref<64x32xf32, #tpu.memory_space<vmem>>, %arg3: memref<4x32xf32, #tpu.memory_space<vmem>>, %arg4: memref<32x32xf32, #tpu.memory_space<vmem>>, %arg5: memref<32x2xf32, #tpu.memory_space<vmem>>, %arg6: memref<1x32xf32, #tpu.memory_space<vmem>>, %arg7: memref<64x2xf32, #tpu.memory_space<vmem>>, %arg8: memref<8x32xf32, #tpu.memory_space<vmem>>, %arg9: memref<8x32xf32, #tpu.memory_space<vmem>>, %arg10: memref<64x32xf32, #tpu.memory_space<vmem>>) attributes {dimension_semantics = [#tpu.dimension_semantics<arbitrary>], iteration_bounds = array<i64: 1>, scalar_prefetch = 0 : i64, scratch_operands = 3 : i64, tpu.core_type = #tpu.core_type<tc>, window_params = [{transform_indices = @transform_0, window_bounds = array<i64: 64, 4>}, {transform_indices = @transform_1, window_bounds = array<i64: 64, 32>}, {pipeline_mode = #tpu.pipeline_mode<synchronous>, transform_indices = @transform_2, window_bounds = array<i64: 4, 32>}, {pipeline_mode = #tpu.pipeline_mode<synchronous>, transform_indices = @transform_3, window_bounds = array<i64: 32, 32>}, {pipeline_mode = #tpu.pipeline_mode<synchronous>, transform_indices = @transform_4, window_bounds = array<i64: 32, 2>}, {pipeline_mode = #tpu.pipeline_mode<synchronous>, transform_indices = @transform_5, window_bounds = array<i64: 1, 32>}, {transform_indices = @transform_6, window_bounds = array<i64: 64, 2>}]} {
    %c0_i32 = arith.constant 0 : i32
    %0 = arith.cmpi eq, %arg0, %c0_i32 : i32
    %1 = arith.extui %0 : i1 to i32
    %c0_i32_0 = arith.constant 0 : i32
    %2 = arith.cmpi ne, %1, %c0_i32_0 : i32
    scf.if %2 {
      %c0_67 = arith.constant 0 : index
      %c0_68 = arith.constant 0 : index
      %116 = vector.load %arg6[%c0_67, %c0_68] : memref<1x32xf32, #tpu.memory_space<vmem>>, vector<1x32xf32>
      %117 = vector.shape_cast %116 : vector<1x32xf32> to vector<1x32xf32>
      %118 = vector.broadcast %117 : vector<1x32xf32> to vector<8x32xf32>
      %c0_69 = arith.constant 0 : index
      %c0_70 = arith.constant 0 : index
      %119 = vector.load %arg8[%c0_69, %c0_70] : memref<8x32xf32, #tpu.memory_space<vmem>>, vector<8x32xf32>
      tpu.vector_store %arg8[%c0_69, %c0_70], %118 {strides = array<i32>} : memref<8x32xf32, #tpu.memory_space<vmem>>, vector<8x32xf32>,
      %120 = math.tanh %118 : vector<8x32xf32>
      %c0_71 = arith.constant 0 : index
      %c0_72 = arith.constant 0 : index
      %121 = vector.load %arg9[%c0_71, %c0_72] : memref<8x32xf32, #tpu.memory_space<vmem>>, vector<8x32xf32>
      tpu.vector_store %arg9[%c0_71, %c0_72], %120 {strides = array<i32>} : memref<8x32xf32, #tpu.memory_space<vmem>>, vector<8x32xf32>,
    } else {
    }
    %c0 = arith.constant 0 : index
    %c0_1 = arith.constant 0 : index
    %3 = vector.load %arg1[%c0, %c0_1] : memref<64x4xf32, #tpu.memory_space<vmem>>, vector<64x4xf32>
    %c0_2 = arith.constant 0 : index
    %c0_3 = arith.constant 0 : index
    %4 = vector.load %arg3[%c0_2, %c0_3] : memref<4x32xf32, #tpu.memory_space<vmem>>, vector<4x32xf32>
    %cst = arith.constant dense<0.000000e+00> : vector<64x32xf32>
    %5 = tpu.matmul %3, %4, %cst {dimension_numbers = #tpu.dot_dimension_numbers<[1], [0], [0], [1], [0, 0, 1, 1], [], []>, precision = #tpu.contract_precision<fp32>} : vector<64x4xf32>, vector<4x32xf32>, vector<64x32xf32> -> vector<64x32xf32>
    %c0_4 = arith.constant 0 : index
    %c0_5 = arith.constant 0 : index
    %6 = vector.load %arg2[%c0_4, %c0_5] : memref<64x32xf32, #tpu.memory_space<vmem>>, vector<64x32xf32>
    %cst_6 = arith.constant 5.000000e-02 : f32
    %7 = vector.broadcast %cst_6 : f32 to vector<64x32xf32>
    %8 = arith.mulf %7, %6 : vector<64x32xf32>
    %9 = arith.addf %8, %5 : vector<64x32xf32>
    %c0_7 = arith.constant 0 : index
    %c0_8 = arith.constant 0 : index
    %10 = vector.load %arg10[%c0_7, %c0_8] : memref<64x32xf32, #tpu.memory_space<vmem>>, vector<64x32xf32>
    tpu.vector_store %arg10[%c0_7, %c0_8], %9 {strides = array<i32>} : memref<64x32xf32, #tpu.memory_space<vmem>>, vector<64x32xf32>,
    %c0_9 = arith.constant 0 : index
    %c0_10 = arith.constant 0 : index
    %11 = vector.load %arg4[%c0_9, %c0_10] : memref<32x32xf32, #tpu.memory_space<vmem>>, vector<32x32xf32>
    %c0_11 = arith.constant 0 : index
    %c0_12 = arith.constant 0 : index
    %12 = vector.load %arg8[%c0_11, %c0_12] : memref<8x32xf32, #tpu.memory_space<vmem>>, vector<8x32xf32>
    %c0_13 = arith.constant 0 : index
    %c0_14 = arith.constant 0 : index
    %13 = vector.load %arg9[%c0_13, %c0_14] : memref<8x32xf32, #tpu.memory_space<vmem>>, vector<8x32xf32>
    %c0_i32_15 = arith.constant 0 : i32
    %c8_i32 = arith.constant 8 : i32
    %14 = arith.muli %c0_i32_15, %c8_i32 : i32
    %15 = tpu.assume_multiple %14, 8 : i32
    %cst_16 = arith.constant dense<0.000000e+00> : vector<8x32xf32>
    %16 = tpu.matmul %13, %11, %cst_16 {dimension_numbers = #tpu.dot_dimension_numbers<[1], [0], [0], [1], [0, 0, 1, 1], [], []>, precision = #tpu.contract_precision<fp32>} : vector<8x32xf32>, vector<32x32xf32>, vector<8x32xf32> -> vector<8x32xf32>
    %cst_17 = arith.constant 8.000000e-01 : f32
    %17 = vector.broadcast %cst_17 : f32 to vector<8x32xf32>
    %18 = arith.mulf %17, %12 : vector<8x32xf32>
    %19 = arith.index_cast %15 : i32 to index
    %c0_18 = arith.constant 0 : index
    %20 = vector.load %arg10[%19, %c0_18] : memref<64x32xf32, #tpu.memory_space<vmem>>, vector<8x32xf32>
    %21 = arith.addf %18, %20 : vector<8x32xf32>
    %22 = arith.addf %21, %16 : vector<8x32xf32>
    %23 = math.tanh %22 : vector<8x32xf32>
    %24 = arith.index_cast %15 : i32 to index
    %c0_19 = arith.constant 0 : index
    %25 = vector.load %arg10[%24, %c0_19] : memref<64x32xf32, #tpu.memory_space<vmem>>, vector<8x32xf32>
    tpu.vector_store %arg10[%24, %c0_19], %23 {strides = array<i32>} : memref<64x32xf32, #tpu.memory_space<vmem>>, vector<8x32xf32>,
    %c1_i32 = arith.constant 1 : i32
    %c8_i32_20 = arith.constant 8 : i32
    %26 = arith.muli %c1_i32, %c8_i32_20 : i32
    %27 = tpu.assume_multiple %26, 8 : i32
    %cst_21 = arith.constant dense<0.000000e+00> : vector<8x32xf32>
    %28 = tpu.matmul %23, %11, %cst_21 {dimension_numbers = #tpu.dot_dimension_numbers<[1], [0], [0], [1], [0, 0, 1, 1], [], []>, precision = #tpu.contract_precision<fp32>} : vector<8x32xf32>, vector<32x32xf32>, vector<8x32xf32> -> vector<8x32xf32>
    %cst_22 = arith.constant 8.000000e-01 : f32
    %29 = vector.broadcast %cst_22 : f32 to vector<8x32xf32>
    %30 = arith.mulf %29, %22 : vector<8x32xf32>
    %31 = arith.index_cast %27 : i32 to index
    %c0_23 = arith.constant 0 : index
    %32 = vector.load %arg10[%31, %c0_23] : memref<64x32xf32, #tpu.memory_space<vmem>>, vector<8x32xf32>
    %33 = arith.addf %30, %32 : vector<8x32xf32>
    %34 = arith.addf %33, %28 : vector<8x32xf32>
    %35 = math.tanh %34 : vector<8x32xf32>
    %36 = arith.index_cast %27 : i32 to index
    %c0_24 = arith.constant 0 : index
    %37 = vector.load %arg10[%36, %c0_24] : memref<64x32xf32, #tpu.memory_space<vmem>>, vector<8x32xf32>
    tpu.vector_store %arg10[%36, %c0_24], %35 {strides = array<i32>} : memref<64x32xf32, #tpu.memory_space<vmem>>, vector<8x32xf32>,
    %c2_i32 = arith.constant 2 : i32
    %c8_i32_25 = arith.constant 8 : i32
    %38 = arith.muli %c2_i32, %c8_i32_25 : i32
    %39 = tpu.assume_multiple %38, 8 : i32
    %cst_26 = arith.constant dense<0.000000e+00> : vector<8x32xf32>
    %40 = tpu.matmul %35, %11, %cst_26 {dimension_numbers = #tpu.dot_dimension_numbers<[1], [0], [0], [1], [0, 0, 1, 1], [], []>, precision = #tpu.contract_precision<fp32>} : vector<8x32xf32>, vector<32x32xf32>, vector<8x32xf32> -> vector<8x32xf32>
    %cst_27 = arith.constant 8.000000e-01 : f32
    %41 = vector.broadcast %cst_27 : f32 to vector<8x32xf32>
    %42 = arith.mulf %41, %34 : vector<8x32xf32>
    %43 = arith.index_cast %39 : i32 to index
    %c0_28 = arith.constant 0 : index
    %44 = vector.load %arg10[%43, %c0_28] : memref<64x32xf32, #tpu.memory_space<vmem>>, vector<8x32xf32>
    %45 = arith.addf %42, %44 : vector<8x32xf32>
    %46 = arith.addf %45, %40 : vector<8x32xf32>
    %47 = math.tanh %46 : vector<8x32xf32>
    %48 = arith.index_cast %39 : i32 to index
    %c0_29 = arith.constant 0 : index
    %49 = vector.load %arg10[%48, %c0_29] : memref<64x32xf32, #tpu.memory_space<vmem>>, vector<8x32xf32>
    tpu.vector_store %arg10[%48, %c0_29], %47 {strides = array<i32>} : memref<64x32xf32, #tpu.memory_space<vmem>>, vector<8x32xf32>,
    %c3_i32 = arith.constant 3 : i32
    %c8_i32_30 = arith.constant 8 : i32
    %50 = arith.muli %c3_i32, %c8_i32_30 : i32
    %51 = tpu.assume_multiple %50, 8 : i32
    %cst_31 = arith.constant dense<0.000000e+00> : vector<8x32xf32>
    %52 = tpu.matmul %47, %11, %cst_31 {dimension_numbers = #tpu.dot_dimension_numbers<[1], [0], [0], [1], [0, 0, 1, 1], [], []>, precision = #tpu.contract_precision<fp32>} : vector<8x32xf32>, vector<32x32xf32>, vector<8x32xf32> -> vector<8x32xf32>
    %cst_32 = arith.constant 8.000000e-01 : f32
    %53 = vector.broadcast %cst_32 : f32 to vector<8x32xf32>
    %54 = arith.mulf %53, %46 : vector<8x32xf32>
    %55 = arith.index_cast %51 : i32 to index
    %c0_33 = arith.constant 0 : index
    %56 = vector.load %arg10[%55, %c0_33] : memref<64x32xf32, #tpu.memory_space<vmem>>, vector<8x32xf32>
    %57 = arith.addf %54, %56 : vector<8x32xf32>
    %58 = arith.addf %57, %52 : vector<8x32xf32>
    %59 = math.tanh %58 : vector<8x32xf32>
    %60 = arith.index_cast %51 : i32 to index
    %c0_34 = arith.constant 0 : index
    %61 = vector.load %arg10[%60, %c0_34] : memref<64x32xf32, #tpu.memory_space<vmem>>, vector<8x32xf32>
    tpu.vector_store %arg10[%60, %c0_34], %59 {strides = array<i32>} : memref<64x32xf32, #tpu.memory_space<vmem>>, vector<8x32xf32>,
    %c4_i32 = arith.constant 4 : i32
    %c8_i32_35 = arith.constant 8 : i32
    %62 = arith.muli %c4_i32, %c8_i32_35 : i32
    %63 = tpu.assume_multiple %62, 8 : i32
    %cst_36 = arith.constant dense<0.000000e+00> : vector<8x32xf32>
    %64 = tpu.matmul %59, %11, %cst_36 {dimension_numbers = #tpu.dot_dimension_numbers<[1], [0], [0], [1], [0, 0, 1, 1], [], []>, precision = #tpu.contract_precision<fp32>} : vector<8x32xf32>, vector<32x32xf32>, vector<8x32xf32> -> vector<8x32xf32>
    %cst_37 = arith.constant 8.000000e-01 : f32
    %65 = vector.broadcast %cst_37 : f32 to vector<8x32xf32>
    %66 = arith.mulf %65, %58 : vector<8x32xf32>
    %67 = arith.index_cast %63 : i32 to index
    %c0_38 = arith.constant 0 : index
    %68 = vector.load %arg10[%67, %c0_38] : memref<64x32xf32, #tpu.memory_space<vmem>>, vector<8x32xf32>
    %69 = arith.addf %66, %68 : vector<8x32xf32>
    %70 = arith.addf %69, %64 : vector<8x32xf32>
    %71 = math.tanh %70 : vector<8x32xf32>
    %72 = arith.index_cast %63 : i32 to index
    %c0_39 = arith.constant 0 : index
    %73 = vector.load %arg10[%72, %c0_39] : memref<64x32xf32, #tpu.memory_space<vmem>>, vector<8x32xf32>
    tpu.vector_store %arg10[%72, %c0_39], %71 {strides = array<i32>} : memref<64x32xf32, #tpu.memory_space<vmem>>, vector<8x32xf32>,
    %c5_i32 = arith.constant 5 : i32
    %c8_i32_40 = arith.constant 8 : i32
    %74 = arith.muli %c5_i32, %c8_i32_40 : i32
    %75 = tpu.assume_multiple %74, 8 : i32
    %cst_41 = arith.constant dense<0.000000e+00> : vector<8x32xf32>
    %76 = tpu.matmul %71, %11, %cst_41 {dimension_numbers = #tpu.dot_dimension_numbers<[1], [0], [0], [1], [0, 0, 1, 1], [], []>, precision = #tpu.contract_precision<fp32>} : vector<8x32xf32>, vector<32x32xf32>, vector<8x32xf32> -> vector<8x32xf32>
    %cst_42 = arith.constant 8.000000e-01 : f32
    %77 = vector.broadcast %cst_42 : f32 to vector<8x32xf32>
    %78 = arith.mulf %77, %70 : vector<8x32xf32>
    %79 = arith.index_cast %75 : i32 to index
    %c0_43 = arith.constant 0 : index
    %80 = vector.load %arg10[%79, %c0_43] : memref<64x32xf32, #tpu.memory_space<vmem>>, vector<8x32xf32>
    %81 = arith.addf %78, %80 : vector<8x32xf32>
    %82 = arith.addf %81, %76 : vector<8x32xf32>
    %83 = math.tanh %82 : vector<8x32xf32>
    %84 = arith.index_cast %75 : i32 to index
    %c0_44 = arith.constant 0 : index
    %85 = vector.load %arg10[%84, %c0_44] : memref<64x32xf32, #tpu.memory_space<vmem>>, vector<8x32xf32>
    tpu.vector_store %arg10[%84, %c0_44], %83 {strides = array<i32>} : memref<64x32xf32, #tpu.memory_space<vmem>>, vector<8x32xf32>,
    %c6_i32 = arith.constant 6 : i32
    %c8_i32_45 = arith.constant 8 : i32
    %86 = arith.muli %c6_i32, %c8_i32_45 : i32
    %87 = tpu.assume_multiple %86, 8 : i32
    %cst_46 = arith.constant dense<0.000000e+00> : vector<8x32xf32>
    %88 = tpu.matmul %83, %11, %cst_46 {dimension_numbers = #tpu.dot_dimension_numbers<[1], [0], [0], [1], [0, 0, 1, 1], [], []>, precision = #tpu.contract_precision<fp32>} : vector<8x32xf32>, vector<32x32xf32>, vector<8x32xf32> -> vector<8x32xf32>
    %cst_47 = arith.constant 8.000000e-01 : f32
    %89 = vector.broadcast %cst_47 : f32 to vector<8x32xf32>
    %90 = arith.mulf %89, %82 : vector<8x32xf32>
    %91 = arith.index_cast %87 : i32 to index
    %c0_48 = arith.constant 0 : index
    %92 = vector.load %arg10[%91, %c0_48] : memref<64x32xf32, #tpu.memory_space<vmem>>, vector<8x32xf32>
    %93 = arith.addf %90, %92 : vector<8x32xf32>
    %94 = arith.addf %93, %88 : vector<8x32xf32>
    %95 = math.tanh %94 : vector<8x32xf32>
    %96 = arith.index_cast %87 : i32 to index
    %c0_49 = arith.constant 0 : index
    %97 = vector.load %arg10[%96, %c0_49] : memref<64x32xf32, #tpu.memory_space<vmem>>, vector<8x32xf32>
    tpu.vector_store %arg10[%96, %c0_49], %95 {strides = array<i32>} : memref<64x32xf32, #tpu.memory_space<vmem>>, vector<8x32xf32>,
    %c7_i32 = arith.constant 7 : i32
    %c8_i32_50 = arith.constant 8 : i32
    %98 = arith.muli %c7_i32, %c8_i32_50 : i32
    %99 = tpu.assume_multiple %98, 8 : i32
    %cst_51 = arith.constant dense<0.000000e+00> : vector<8x32xf32>
    %100 = tpu.matmul %95, %11, %cst_51 {dimension_numbers = #tpu.dot_dimension_numbers<[1], [0], [0], [1], [0, 0, 1, 1], [], []>, precision = #tpu.contract_precision<fp32>} : vector<8x32xf32>, vector<32x32xf32>, vector<8x32xf32> -> vector<8x32xf32>
    %cst_52 = arith.constant 8.000000e-01 : f32
    %101 = vector.broadcast %cst_52 : f32 to vector<8x32xf32>
    %102 = arith.mulf %101, %94 : vector<8x32xf32>
    %103 = arith.index_cast %99 : i32 to index
    %c0_53 = arith.constant 0 : index
    %104 = vector.load %arg10[%103, %c0_53] : memref<64x32xf32, #tpu.memory_space<vmem>>, vector<8x32xf32>
    %105 = arith.addf %102, %104 : vector<8x32xf32>
    %106 = arith.addf %105, %100 : vector<8x32xf32>
    %107 = math.tanh %106 : vector<8x32xf32>
    %108 = arith.index_cast %99 : i32 to index
    %c0_54 = arith.constant 0 : index
    %109 = vector.load %arg10[%108, %c0_54] : memref<64x32xf32, #tpu.memory_space<vmem>>, vector<8x32xf32>
    tpu.vector_store %arg10[%108, %c0_54], %107 {strides = array<i32>} : memref<64x32xf32, #tpu.memory_space<vmem>>, vector<8x32xf32>,
    %c8_i32_55 = arith.constant 8 : i32
    %c0_56 = arith.constant 0 : index
    %c0_57 = arith.constant 0 : index
    %110 = vector.load %arg8[%c0_56, %c0_57] : memref<8x32xf32, #tpu.memory_space<vmem>>, vector<8x32xf32>
    tpu.vector_store %arg8[%c0_56, %c0_57], %106 {strides = array<i32>} : memref<8x32xf32, #tpu.memory_space<vmem>>, vector<8x32xf32>,
    %c0_58 = arith.constant 0 : index
    %c0_59 = arith.constant 0 : index
    %111 = vector.load %arg9[%c0_58, %c0_59] : memref<8x32xf32, #tpu.memory_space<vmem>>, vector<8x32xf32>
    tpu.vector_store %arg9[%c0_58, %c0_59], %107 {strides = array<i32>} : memref<8x32xf32, #tpu.memory_space<vmem>>, vector<8x32xf32>,
    %c0_60 = arith.constant 0 : index
    %c0_61 = arith.constant 0 : index
    %112 = vector.load %arg10[%c0_60, %c0_61] : memref<64x32xf32, #tpu.memory_space<vmem>>, vector<64x32xf32>
    %c0_62 = arith.constant 0 : index
    %c0_63 = arith.constant 0 : index
    %113 = vector.load %arg5[%c0_62, %c0_63] : memref<32x2xf32, #tpu.memory_space<vmem>>, vector<32x2xf32>
    %cst_64 = arith.constant dense<0.000000e+00> : vector<64x2xf32>
    %114 = tpu.matmul %112, %113, %cst_64 {dimension_numbers = #tpu.dot_dimension_numbers<[1], [0], [0], [1], [0, 0, 1, 1], [], []>, precision = #tpu.contract_precision<fp32>} : vector<64x32xf32>, vector<32x2xf32>, vector<64x2xf32> -> vector<64x2xf32>
    %c0_65 = arith.constant 0 : index
    %c0_66 = arith.constant 0 : index
    %115 = vector.load %arg7[%c0_65, %c0_66] : memref<64x2xf32, #tpu.memory_space<vmem>>, vector<64x2xf32>
    tpu.vector_store %arg7[%c0_65, %c0_66], %114 {strides = array<i32>} : memref<64x2xf32, #tpu.memory_space<vmem>>, vector<64x2xf32>,
    return
  }
  func.func @transform_0(%arg0: i32) -> (i32, i32) {
    %c0_i32 = arith.constant 0 : i32
    %c0_i32_0 = arith.constant 0 : i32
    return %arg0, %c0_i32 : i32, i32
  }
  func.func @transform_1(%arg0: i32) -> (i32, i32) {
    %c0_i32 = arith.constant 0 : i32
    %c0_i32_0 = arith.constant 0 : i32
    return %arg0, %c0_i32 : i32, i32
  }
  func.func @transform_2(%arg0: i32) -> (i32, i32) {
    %c0_i32 = arith.constant 0 : i32
    %c0_i32_0 = arith.constant 0 : i32
    %c0_i32_1 = arith.constant 0 : i32
    return %c0_i32, %c0_i32_0 : i32, i32
  }
  func.func @transform_3(%arg0: i32) -> (i32, i32) {
    %c0_i32 = arith.constant 0 : i32
    %c0_i32_0 = arith.constant 0 : i32
    %c0_i32_1 = arith.constant 0 : i32
    return %c0_i32, %c0_i32_0 : i32, i32
  }
  func.func @transform_4(%arg0: i32) -> (i32, i32) {
    %c0_i32 = arith.constant 0 : i32
    %c0_i32_0 = arith.constant 0 : i32
    %c0_i32_1 = arith.constant 0 : i32
    return %c0_i32, %c0_i32_0 : i32, i32
  }
  func.func @transform_5(%arg0: i32) -> (i32, i32) {
    %c0_i32 = arith.constant 0 : i32
    %c0_i32_0 = arith.constant 0 : i32
    %c0_i32_1 = arith.constant 0 : i32
    return %c0_i32, %c0_i32_0 : i32, i32
  }
  func.func @transform_6(%arg0: i32) -> (i32, i32) {
    %c0_i32 = arith.constant 0 : i32
    %c0_i32_0 = arith.constant 0 : i32
    return %arg0, %c0_i32 : i32, i32
  }
}

</mosaic_0001>

<bundles_post_ra>
// kernel: tpu_custom_call.1
= control target key start
LH: loop header
LB: loop body
LE: loop exit
PB: predicated region body
PF: predicated region fallthrough
CT: control target
= control target key end

     0   :  { %vm72_vm0 = vcmask 1043456   ;;  %vm47_vm1 = vcmask 31744   ;;  %vm34_vm2 = vcmask 261120   ;;  %vm7195_vm3 = vmmov 0   ;;  %s7968_s2 = inlined_call_operand.vmem [shape: f32[4,32], index: 2, kind: input, shape index: {}]   ;;  %s7969_s0 = inlined_call_operand.vmem [shape: f32[64,4], index: 0, kind: input, shape index: {}]   ;;  %s7970_s5 = inlined_call_operand.vmem [shape: f32[1,32], index: 5, kind: input, shape index: {}]   ;;  %s7971_s3 = inlined_call_operand.vmem [shape: f32[32,32], index: 3, kind: input, shape index: {}]   ;;  %s7972_s1 = inlined_call_operand.vmem [shape: f32[64,32], index: 1, kind: input, shape index: {}]   ;;  %s7973_s4 = inlined_call_operand.vmem [shape: f32[32,2], index: 4, kind: input, shape index: {}]   ;;  %s7974_s6 = inlined_call_operand.vmem [shape: f32[64,2], index: 6, kind: output, shape index: {}]  }
   0x1   :  { %v46_v0 = vld [vmem:[%s7968_s2] sm:$0xf]  ;;  %v39_v2 = vld [vmem:[%s7969_s0 + $0x8] sm:$0xff]  ;;  %v40_v6 = vld [vmem:[%s7969_s0 + $0x10] sm:$0xff]  ;;  %vm5645_vm4 = vcmask 15360  }
   0x2   :  { %v38_v1 = vld [vmem:[%s7969_s0] sm:$0xff]  ;;  %v74_v3 = vsel %vm72_vm0, %v46_v0, 0  ;;  %v52_v5 = vsel %vm47_vm1, %v39_v2, 0  ;;  %v41_v7 = vld [vmem:[%s7969_s0 + $0x18] sm:$0xff]  ;;  %v55_v12 = vsel %vm47_vm1, %v40_v6, 0  ;;  %v43_v13 = vld [vmem:[%s7969_s0 + $0x28] sm:$0xff] }
   0x3   :  { %v49_v4 = vsel %vm47_vm1, %v38_v1, 0  ;;  %v42_v8 = vld [vmem:[%s7969_s0 + $0x20] sm:$0xff]  ;;  %v7252_v9 = vand.u32 4294901760, %v74_v3  ;;  %v7256_v11 = vand.u32 4294901760, %v52_v5  ;;  %v44_v14 = vld [vmem:[%s7969_s0 + $0x30] sm:$0xff]  ;;  %v7265_v15 = vand.u32 4294901760, %v55_v12 }
   0x4   :  { %v7254_v10 = vand.u32 4294901760, %v49_v4  ;;  %v58_v16 = vsel %vm47_vm1, %v41_v7, 0  ;;  %v61_v17 = vsel %vm47_vm1, %v42_v8, 0  ;;  %v64_v18 = vsel %vm47_vm1, %v43_v13, 0  ;;  %v5658_v27 = vld [vmem:[%s7970_s5] ss:$0 sm:$0xff] }
   0x5   :  { %6025 = vmatprep.subr.mxu1 %v7252_v9  ;;  %6067 = vmatprep.subr.mxu0 %v7252_v9  ;;  %v7276_v20 = vsub.f32 %v74_v3, %v7252_v9  ;;  %v7279_v21 = vsub.f32 %v52_v5, %v7256_v11  ;;  %v7281_v22 = vand.u32 4294901760, %v58_v16  ;;  %v7286_v23 = vsub.f32 %v55_v12, %v7265_v15  ;;  %v45_v44 = vld [vmem:[%s7969_s0 + $0x38] sm:$0xff]  ;;  %v856_v2 = vld [vmem:[%s7971_s3] sm:$0xff]  ;;  %v857_v3 = vld [vmem:[%s7971_s3 + $0x8] sm:$0xff] }
   0x6   :  { %v7273_v19 = vsub.f32 %v49_v4, %v7254_v10  ;;  %6026 = vmatpush3.msra.mxu1 %v7252_v9  ;;  %6068 = vmatpush3.msra.mxu0 %v7252_v9  ;;  %v7288_v24 = vand.u32 4294901760, %v61_v17  ;;  %v7290_v25 = vand.u32 4294901760, %v64_v18  ;;  %v67_v26 = vsel %vm47_vm1, %v44_v14, 0  ;;  %35 = vst.msk [vmem:[#allocation2] sm:$0xff] %vm34_vm2, %v5658_v27  ;;  %v858_v7 = vld [vmem:[%s7971_s3 + $0x10] sm:$0xff]  ;;  %v859_v8 = vld [vmem:[%s7971_s3 + $0x18] sm:$0xff] }
   0x7   :  { %v225_v29 = vand.u32 4294901760, %v7276_v20  ;;  %v154_v30 = vand.u32 4294901760, %v7279_v21  ;;  %v7300_v31 = vsub.f32 %v58_v16, %v7281_v22  ;;  %v164_v32 = vand.u32 4294901760, %v7286_v23 }
   0x8   :  { %v144_v28 = vand.u32 4294901760, %v7273_v19  ;;  %v7305_v33 = vsub.f32 %v61_v17, %v7288_v24  ;;  %v7308_v34 = vsub.f32 %v64_v18, %v7290_v25  ;;  %v7310_v35 = vand.u32 4294901760, %v67_v26 }
   0x9   :  { %v226_v37 = vsub.f32 %v7276_v20, %v225_v29  ;;  %v155_v38 = vsub.f32 %v7279_v21, %v154_v30  ;;  %v174_v39 = vand.u32 4294901760, %v7300_v31  ;;  %6081 = vmatprep.subr.mxu0 %v225_v29  ;;  %v165_v40 = vsub.f32 %v7286_v23, %v164_v32 }
   0xa   :  { %v145_v36 = vsub.f32 %v7273_v19, %v144_v28  ;;  %6069 = vmatprep.mubr.f32.mxu0 %v144_v28  ;;  %v184_v41 = vand.u32 4294901760, %v7305_v33  ;;  %v194_v42 = vand.u32 4294901760, %v7308_v34  ;;  %v7320_v43 = vsub.f32 %v67_v26, %v7310_v35 }
   0xb   :  { %6070 = vmatmul.mubr.f32.vlgmr.msra.gmra.mrb[0].mxu0 %v154_v30  ;;  %v227_v46 = vand.u32 4294901760, %v226_v37  ;;  %v156_v47 = vand.u32 4294901760, %v155_v38  ;;  %v175_v48 = vsub.f32 %v7300_v31, %v174_v39  ;;  %v166_v49 = vand.u32 4294901760, %v165_v40 }
   0xc   :  { %v146_v45 = vand.u32 4294901760, %v145_v36  ;;  %6072 = vmatprep.mubr.f32.mxu0 %v164_v32  ;;  %6082 = vmatpush3.msra.mxu0 %v225_v29  ;;  %v185_v50 = vsub.f32 %v7305_v33, %v184_v41  ;;  %v204_v51 = vand.u32 4294901760, %v7320_v43  ;;  %v70_v52 = vsel %vm47_vm1, %v45_v44, 0 }
   0xd   :  { %6095 = vmatprep.subr.mxu0 %v7252_v9  ;;  %6039 = vmatprep.subr.mxu1 %v227_v46  ;;  %v176_v53 = vand.u32 4294901760, %v175_v48  ;;  %v195_v54 = vsub.f32 %v7308_v34, %v194_v42  ;;  %v7331_v55 = vand.u32 4294901760, %v70_v52  ;;  %7176 = vtanh.f32 %v5658_v27 }
   0xe   :  { %6027 = vmatprep.mubr.f32.mxu1 %v146_v45  ;;  %v186_v56 = vand.u32 4294901760, %v185_v50  ;;  %v205_v57 = vsub.f32 %v7320_v43, %v204_v51  ;;  %v7194_v1 = vmov 0.0|0.0   ;;  %v866_v5 = vand.u32 4294901760, %v856_v2  ;;  %v823_v45 = vld [vmem:[%s7972_s1] sm:$0xff]  ;;  %v826_v50 = vld [vmem:[%s7972_s1 + $0x18] sm:$0xff] }
   0xf   :  { %6028 = vmatmul.mubr.f32.vlgmr.msra.gmra.mrb[0].mxu1 %v156_v47  ;;  %6073 = vmatmul.mubr.f32.gmra.mrb[2].mxu0 %v174_v39  ;;  %v7335_v58 = vsub.f32 %v70_v52, %v7331_v55  ;;  %v196_v59 = vand.u32 4294901760, %v195_v54  ;;  %v869_v6 = vand.u32 4294901760, %v857_v3  ;;  %v872_v13 = vand.u32 4294901760, %v858_v7  ;;  %v825_v54 = vld [vmem:[%s7972_s1 + $0x10] sm:$0xff] }
  0x10   :  { %6040 = vmatpush3.msra.mxu1 %v227_v46  ;;  %6030 = vmatprep.mubr.f32.mxu1 %v166_v49  ;;  %v206_v61 = vand.u32 4294901760, %v205_v57  ;;  %v875_v14 = vand.u32 4294901760, %v859_v8  ;;  %v7196_v32 = vmov 0.0   ;;  %v831_v48 = vmul.f32 0.05, %v823_v45 }
  0x11   :  { %6075 = vmatprep.mubr.f32.mxu0 %v184_v41  ;;  %6053 = vmatprep.subr.mxu1 %v7276_v20  ;;  %v214_v60 = vand.u32 4294901760, %v7335_v58  ;;  %v7376_v12 = vpack.c.bf16 %v869_v6, %v866_v5  ;;  %v7384_v17 = vsub.f32 %v857_v3, %v869_v6  ;;  %v834_v57 = vmul.f32 0.05, %v826_v50  ;;  %v827_v3 = vld [vmem:[%s7972_s1 + $0x20] sm:$0xff] }
  0x12   :  { %v967_v26 = vsub.f32 %v859_v8, %v875_v14  ;;  %v860_v50 = vld [vmem:[#allocation2] sm:$0xff] }
  0x13   :  { %6031 = vmatmul.mubr.f32.gmra.mrb[2].mxu1 %v176_v53  ;;  %6076 = vmatmul.mubr.f32.gmra.mrb[4].mxu0 %v194_v42  ;;  %v215_v62 = vsub.f32 %v7335_v58, %v214_v60 }
  0x14   :  { %6033 = vmatprep.mubr.f32.mxu1 %v186_v56  ;;  %6078 = vmatprep.mubr.f32.mxu0 %v204_v51  ;;  %v968_v28 = vand.u32 4294901760, %v967_v26 }
  0x15   :  { %v216_v63 = vand.u32 4294901760, %v215_v62  ;;  %v828_v62 = vld [vmem:[%s7972_s1 + $0x28] sm:$0xff] }
  0x16   :  { %v836_v6 = vmul.f32 0.05, %v828_v62 }
  0x17   :  { %6034 = vmatmul.mubr.f32.gmra.mrb[4].mxu1 %v196_v59  ;;  %6079 = vmatmul.mubr.f32.gmra.mrb[6].mxu0 %v214_v60  ;;  %v7177_v0 = vpop.eup %7176  ;;  %v833_v60 = vmul.f32 0.05, %v825_v54 }
  0x18   :  { %6036 = vmatprep.mubr.f32.mxu1 %v206_v61  ;;  %6083 = vmatprep.mubr.f32.mxu0 %v7254_v10  ;;  %37 = vst.msk [vmem:[#allocation3] sm:$0xff] %vm34_vm2, %v7177_v0 }
  0x1b   :  { %6037 = vmatmul.mubr.f32.gmra.mrb[6].mxu1 %v216_v63  ;;  %6084 = vmatmul.mubr.f32.vlgmr.msra.gmra.mrb[0].mxu0 %v7256_v11 }
  0x1c   :  { %6041 = vmatprep.mubr.f32.mxu1 %v7254_v10  ;;  %6086 = vmatprep.mubr.f32.mxu0 %v7265_v15 }
  0x1d   :  { %6096 = vmatpush3.msra.mxu0 %v7252_v9 }
  0x1e   :  { %6829 = vmatprep.subr.bf16.mxu0 %v7194_v1 }
  0x1f   :  { %6042 = vmatmul.mubr.f32.vlgmr.msra.gmra.mrb[0].mxu1 %v7256_v11  ;;  %6087 = vmatmul.mubr.f32.gmra.mrb[2].mxu0 %v7281_v22  ;;  %v861_v4 = vld [vmem:[#allocation3] sm:$0xff] }
  0x20   :  { %6054 = vmatpush3.msra.mxu1 %v7276_v20  ;;  %6044 = vmatprep.mubr.f32.mxu1 %v7265_v15  ;;  %v863_v9 = vsel %vm34_vm2, %v861_v4, 0  ;;  %v960_v20 = vsub.f32 %v858_v7, %v872_v13 }
  0x21   :  { %6089 = vmatprep.mubr.f32.mxu0 %v7288_v24  ;;  %6757 = vmatprep.subr.bf16.mxu1 %v7194_v1  ;;  %v7378_v16 = vand.u32 4294901760, %v863_v9 }
  0x22   :  { %v961_v27 = vand.u32 4294901760, %v960_v20  ;;  %v7433_v39 = vpack.c.bf16 %v967_v26, %v960_v20 }
  0x23   :  { %6045 = vmatmul.mubr.f32.gmra.mrb[2].mxu1 %v7281_v22  ;;  %6090 = vmatmul.mubr.f32.gmra.mrb[4].mxu0 %v7290_v25  ;;  %v935_v18 = vsub.f32 %v863_v9, %v7378_v16  ;;  %v835_v9 = vmul.f32 0.05, %v827_v3 }
  0x24   :  { %6047 = vmatprep.mubr.f32.mxu1 %v7288_v24  ;;  %6092 = vmatprep.mubr.f32.mxu0 %v7310_v35  ;;  %v962_v30 = vsub.f32 %v960_v20, %v961_v27  ;;  %v7449_v41 = vpack.c.bf16 %v968_v28, %v961_v27 }
  0x27   :  { %6048 = vmatmul.mubr.f32.gmra.mrb[4].mxu1 %v7290_v25  ;;  %6093 = vmatmul.mubr.f32.gmra.mrb[6].mxu0 %v7331_v55 }
  0x28   :  { %6050 = vmatprep.mubr.f32.mxu1 %v7310_v35  ;;  %6097 = vmatprep.mubr.f32.mxu0 %v7254_v10  ;;  %v7382_v10 = vsub.f32 %v856_v2, %v866_v5 }
  0x2a   :  { %v7428_v38 = vpack.c.bf16 %v7384_v17, %v7382_v10 }
  0x2b   :  { %6051 = vmatmul.mubr.f32.gmra.mrb[6].mxu1 %v7331_v55  ;;  %6098 = vmatmul.mubr.f32.vlgmr.msra.gmra.mrb[0].mxu0 %v7256_v11  ;;  %v7390_v11 = vpack.c.bf16 %v875_v14, %v872_v13  ;;  %v830_v14 = vld [vmem:[%s7972_s1 + $0x38] sm:$0xff] }
  0x2c   :  { %6055 = vmatprep.mubr.f32.mxu1 %v7273_v19  ;;  %6100 = vmatprep.mubr.f32.mxu0 %v7265_v15  ;;  %v947_v15 = vand.u32 4294901760, %v7382_v10  ;;  %v954_v19 = vand.u32 4294901760, %v7384_v17  ;;  %v838_v20 = vmul.f32 0.05, %v830_v14 }
  0x2d   :  { %6831 = vmatpush3.bf16.msra.mxu0 %v7376_v12 }
  0x2e   :  { %6832 = vmatprep.subr.bf16.mxu0 %v7194_v1  ;;  %v7445_v40 = vpack.c.bf16 %v954_v19, %v947_v15 }
  0x2f   :  { %6056 = vmatmul.mubr.f32.vlgmr.msra.gmra.mrb[0].mxu1 %v7279_v21  ;;  %6101 = vmatmul.mubr.f32.gmra.mrb[2].mxu0 %v7281_v22  ;;  %v936_v21 = vand.u32 4294901760, %v935_v18  ;;  %v948_v22 = vsub.f32 %v7382_v10, %v947_v15 }
  0x30   :  { %6759 = vmatpush3.bf16.msra.mxu1 %v7376_v12  ;;  %6058 = vmatprep.mubr.f32.mxu1 %v7286_v23  ;;  %v955_v23 = vsub.f32 %v7384_v17, %v954_v19 }
  0x31   :  { %6103 = vmatprep.mubr.f32.mxu0 %v7288_v24  ;;  %6760 = vmatprep.subr.bf16.mxu1 %v7194_v1  ;;  %v937_v24 = vsub.f32 %v935_v18, %v936_v21 }
  0x32   :  { %6834 = vmatpush3.bf16.msra.mxu0 %v7390_v11  ;;  %v956_v29 = vand.u32 4294901760, %v955_v23 }
  0x33   :  { %6059 = vmatmul.mubr.f32.gmra.mrb[2].mxu1 %v7300_v31  ;;  %6104 = vmatmul.mubr.f32.gmra.mrb[4].mxu0 %v7290_v25  ;;  %v949_v25 = vand.u32 4294901760, %v948_v22  ;;  %v969_v31 = vsub.f32 %v967_v26, %v968_v28 }
  0x34   :  { %6061 = vmatprep.mubr.f32.mxu1 %v7305_v33  ;;  %6762 = vmatpush3.bf16.msra.mxu1 %v7390_v11  ;;  %v938_v33 = vand.u32 4294901760, %v937_v24 }
  0x35   :  { %6106 = vmatprep.mubr.f32.mxu0 %v7310_v35  ;;  %6763 = vmatprep.subr.bf16.mxu1 %v7194_v1  ;;  %v963_v35 = vand.u32 4294901760, %v962_v30  ;;  %v970_v36 = vand.u32 4294901760, %v969_v31 }
  0x36   :  { %6841 = vmatprep.subr.bf16.mxu0 %v7194_v1 }
  0x37   :  { %6062 = vmatmul.mubr.f32.gmra.mrb[4].mxu1 %v7308_v34  ;;  %6107 = vmatmul.mubr.f32.gmra.mrb[6].mxu0 %v7331_v55  ;;  %v7417_v34 = vpack.c.bf16 %v956_v29, %v949_v25  ;;  %v7420_v37 = vpack.c.bf16 %v970_v36, %v963_v35 }
  0x38   :  { %6064 = vmatprep.mubr.f32.mxu1 %v7320_v43  ;;  %6249 = vmatprep.mubr.msk.f32.mxu0 %vm7195_vm3, %v7196_v32  ;;  %v824_v43 = vld [vmem:[%s7972_s1 + $0x8] sm:$0xff] }
  0x39   :  { %v832_v46 = vmul.f32 0.05, %v824_v43 }
  0x3b   :  { %6065 = vmatmul.mubr.f32.gmra.mrb[6].mxu1 %v7335_v58 }
  0x3c   :  { %6117 = vmatprep.mubr.msk.f32.mxu1 %vm7195_vm3, %v7196_v32 }
  0x3f   :  { %6118 = vmatmul.mubr.f32.vlgmr.msra.gmra.mrb[8].mxu1 %v938_v33 }
  0x40   :  { %6765 = vmatpush3.bf16.msra.mxu1 %v7417_v34  ;;  %6128 = vmatprep.mubr.msk.f32.mxu1 %vm7195_vm3, %v7196_v32 }
  0x41   :  { %6766 = vmatprep.subr.bf16.mxu1 %v7194_v1 }
  0x44   :  { %6768 = vmatpush3.bf16.msra.mxu1 %v7420_v37 }
  0x45   :  { %6769 = vmatprep.subr.bf16.mxu1 %v7194_v1 }
  0x47   :  { %6129 = vmatmul.mubr.f32.vlgmr.msra.gmra.mrb[10].mxu1 %v7378_v16 }
  0x48   :  { %6771 = vmatpush3.bf16.msra.mxu1 %v7428_v38  ;;  %6139 = vmatprep.mubr.msk.f32.mxu1 %vm7195_vm3, %v7196_v32 }
  0x49   :  { %6772 = vmatprep.subr.bf16.mxu1 %v7194_v1 }
  0x4c   :  { %6774 = vmatpush3.bf16.msra.mxu1 %v7433_v39 }
  0x4d   :  { %6775 = vmatprep.subr.bf16.mxu1 %v7194_v1 }
  0x4f   :  { %6140 = vmatmul.mubr.f32.vlgmr.msra.gmra.mrb[12].mxu1 %v935_v18  ;;  %v829_v18 = vld [vmem:[%s7972_s1 + $0x30] sm:$0xff] }
  0x50   :  { %6777 = vmatpush3.bf16.msra.mxu1 %v7376_v12  ;;  %6150 = vmatprep.mubr.msk.f32.mxu1 %vm7195_vm3, %v7196_v32  ;;  %v837_v22 = vmul.f32 0.05, %v829_v18 }
  0x51   :  { %6778 = vmatprep.subr.bf16.mxu1 %v7194_v1 }
  0x54   :  { %6780 = vmatpush3.bf16.msra.mxu1 %v7390_v11 }
  0x55   :  { %6781 = vmatprep.subr.bf16.mxu1 %v7194_v1 }
  0x57   :  { %6151 = vmatmul.mubr.f32.vlgmr.msra.gmra.mrb[14].mxu1 %v936_v21 }
  0x58   :  { %6783 = vmatpush3.bf16.msra.mxu1 %v7445_v40  ;;  %6161 = vmatprep.mubr.msk.f32.mxu1 %vm7195_vm3, %v7196_v32 }
  0x59   :  { %6784 = vmatprep.subr.bf16.mxu1 %v7194_v1 }
  0x5c   :  { %6786 = vmatpush3.bf16.msra.mxu1 %v7449_v41 }
  0x5d   :  { %6787 = vmatprep.subr.bf16.mxu1 %v7194_v1 }
  0x5f   :  { %6162 = vmatmul.mubr.f32.vlgmr.msra.gmra.mrb[16].mxu1 %v7378_v16 }
  0x60   :  { %6789 = vmatpush3.bf16.msra.mxu1 %v7376_v12  ;;  %6172 = vmatprep.mubr.msk.f32.mxu1 %vm7195_vm3, %v7196_v32 }
  0x61   :  { %6790 = vmatprep.subr.bf16.mxu1 %v7194_v1 }
  0x64   :  { %6792 = vmatpush3.bf16.msra.mxu1 %v7390_v11 }
  0x65   :  { %6793 = vmatprep.subr.bf16.mxu1 %v7194_v1 }
  0x67   :  { %6173 = vmatmul.mubr.f32.vlgmr.msra.gmra.mrb[18].mxu1 %v7378_v16 }
  0x68   :  { %6795 = vmatpush3.bf16.msra.mxu1 %v7376_v12  ;;  %6183 = vmatprep.mubr.msk.f32.mxu1 %vm7195_vm3, %v7196_v32 }
  0x69   :  { %6796 = vmatprep.subr.bf16.mxu1 %v7194_v1 }
  0x6c   :  { %6798 = vmatpush3.bf16.msra.mxu1 %v7390_v11 }
  0x6d   :  { %6799 = vmatprep.subr.bf16.mxu1 %v7194_v1 }
  0xfe   :  { %v6099_v42 = vpop.f32.mrb[0].mxu0 }
  0xff   :  { %v777_v44 = vpop.f32.mrb[1].mxu0 }
 0x102   :  { %v6057_v47 = vpop.f32.mrb[0].mxu1  ;;  %v6102_v49 = vpop.f32.mrb[2].mxu0 }
 0x103   :  { %v7093_v51 = vadd.f32 %v6099_v42, %v6057_v47  ;;  %v410_v52 = vpop.f32.mrb[1].mxu1  ;;  %v789_v53 = vpop.f32.mrb[3].mxu0 }
 0x104   :  { %v7094_v55 = vadd.f32 %v777_v44, %v410_v52 }
 0x105   :  { %v840_v56 = vadd.f32 %v7093_v51, %v832_v46  ;;  %v1350_v51 = vmul.f32 0.8, %v860_v50 }
 0x106   :  { %v839_v58 = vadd.f32 %v7094_v55, %v831_v48  ;;  %v6060_v59 = vpop.f32.mrb[2].mxu1  ;;  %v6105_v61 = vpop.f32.mrb[4].mxu0 }
 0x107   :  { %849 = vst.msk [vmem:[#allocation4 + $0x8] sm:$0xff] %vm34_vm2, %v840_v56  ;;  %v7095_v63 = vadd.f32 %v6102_v49, %v6060_v59  ;;  %v424_v0 = vpop.f32.mrb[3].mxu1  ;;  %v801_v2 = vpop.f32.mrb[5].mxu0 }
 0x108   :  { %848 = vst.msk [vmem:[#allocation4] sm:$0xff] %vm34_vm2, %v839_v58  ;;  %v7096_v4 = vadd.f32 %v789_v53, %v424_v0 }
 0x109   :  { %v842_v5 = vadd.f32 %v7095_v63, %v834_v57 }
 0x10a   :  { %v841_v7 = vadd.f32 %v7096_v4, %v833_v60  ;;  %v6063_v8 = vpop.f32.mrb[4].mxu1  ;;  %v6108_v13 = vpop.f32.mrb[6].mxu0 }
 0x10b   :  { %851 = vst.msk [vmem:[#allocation4 + $0x18] sm:$0xff] %vm34_vm2, %v842_v5  ;;  %v7097_v16 = vadd.f32 %v6105_v61, %v6063_v8  ;;  %v438_v10 = vpop.f32.mrb[5].mxu1  ;;  %v813_v17 = vpop.f32.mrb[7].mxu0 }
 0x10c   :  { %850 = vst.msk [vmem:[#allocation4 + $0x10] sm:$0xff] %vm34_vm2, %v841_v7  ;;  %v7098_v15 = vadd.f32 %v801_v2, %v438_v10 }
 0x10d   :  { %v844_v19 = vadd.f32 %v7097_v16, %v836_v6 }
 0x10e   :  { %v843_v26 = vadd.f32 %v7098_v15, %v835_v9  ;;  %v6066_v21 = vpop.f32.mrb[6].mxu1 }
 0x10f   :  { %853 = vst.msk [vmem:[#allocation4 + $0x28] sm:$0xff] %vm34_vm2, %v844_v19  ;;  %v7099_v23 = vadd.f32 %v6108_v13, %v6066_v21  ;;  %v452_v27 = vpop.f32.mrb[7].mxu1  ;;  %v1351_v52 = vld [vmem:[#allocation4] sm:$0xff] }
 0x110   :  { %852 = vst.msk [vmem:[#allocation4 + $0x20] sm:$0xff] %vm34_vm2, %v843_v26  ;;  %v7100_v28 = vadd.f32 %v813_v17, %v452_v27  ;;  %v1352_v55 = vadd.f32 %v1351_v52, %v1350_v51 }
 0x111   :  { %v846_v24 = vadd.f32 %v7099_v23, %v838_v20  ;;  %v1846_v20 = vld [vmem:[#allocation4 + $0x8] sm:$0xff] }
 0x112   :  { %v845_v25 = vadd.f32 %v7100_v28, %v837_v22  ;;  %v940_v29 = vpop.f32.mrb[8].mxu1 }
 0x113   :  { %855 = vst.msk [vmem:[#allocation4 + $0x38] sm:$0xff] %vm34_vm2, %v846_v24  ;;  %v6119_v30 = vpop.f32.mrb[9].mxu1 }
 0x114   :  { %854 = vst.msk [vmem:[#allocation4 + $0x30] sm:$0xff] %vm34_vm2, %v845_v25 }
 0x11a   :  { %v1031_v31 = vpop.f32.mrb[10].mxu1 }
 0x11b   :  { %v1032_v33 = vadd.f32 %v1031_v31, %v940_v29  ;;  %v6130_v35 = vpop.f32.mrb[11].mxu1 }
 0x122   :  { %v1111_v36 = vpop.f32.mrb[12].mxu1 }
 0x123   :  { %v1112_v42 = vadd.f32 %v1111_v36, %v1032_v33  ;;  %v6141_v43 = vpop.f32.mrb[13].mxu1 }
 0x12a   :  { %v1188_v44 = vpop.f32.mrb[14].mxu1 }
 0x12b   :  { %v1189_v45 = vadd.f32 %v1188_v44, %v1112_v42  ;;  %v6152_v46 = vpop.f32.mrb[15].mxu1 }
 0x132   :  { %v1271_v47 = vpop.f32.mrb[16].mxu1 }
 0x133   :  { %v1272_v48 = vadd.f32 %v1271_v47, %v1189_v45  ;;  %v6163_v49 = vpop.f32.mrb[17].mxu1 }
 0x13a   :  { %v1346_v53 = vpop.f32.mrb[18].mxu1 }
 0x13b   :  { %v1347_v54 = vadd.f32 %v1346_v53, %v1272_v48  ;;  %v6174_v56 = vpop.f32.mrb[19].mxu1 }
 0x13c   :  { %v2341_v56 = vld [vmem:[#allocation4 + $0x10] sm:$0xff] }
 0x13d   :  { %v1353_v57 = vadd.f32 %v1352_v55, %v1347_v54 }
 0x13f   :  { %7178 = vtanh.f32 %v1353_v57  ;;  %v1844_v15 = vmul.f32 0.8, %v1353_v57 }
 0x141   :  { %v1847_v21 = vadd.f32 %v1846_v20, %v1844_v15 }
 0x149   :  { %v7179_v58 = vpop.eup %7178 }
 0x14a   :  { %1355 = vst.msk [vmem:[#allocation4] sm:$0xff] %vm34_vm2, %v7179_v58  ;;  %v1357_v59 = vsel %vm34_vm2, %v7179_v58, 0 }
 0x14b   :  { %v1428_v60 = vand.u32 4294901760, %v1357_v59 }
 0x14d   :  { %v1429_v61 = vsub.f32 %v1357_v59, %v1428_v60 }
 0x14f   :  { %v1430_v62 = vand.u32 4294901760, %v1429_v61 }
 0x151   :  { %v1431_v63 = vsub.f32 %v1429_v61, %v1430_v62 }
 0x153   :  { %v1432_v0 = vand.u32 4294901760, %v1431_v63 }
 0x155   :  { %6184 = vmatmul.mubr.f32.vlgmr.msra.gmra.mrb[20].mxu1 %v1432_v0 }
 0x156   :  { %6801 = vmatpush3.bf16.msra.mxu1 %v7417_v34  ;;  %6194 = vmatprep.mubr.msk.f32.mxu1 %vm7195_vm3, %v7196_v32 }
 0x157   :  { %6802 = vmatprep.subr.bf16.mxu1 %v7194_v1 }
 0x15a   :  { %6804 = vmatpush3.bf16.msra.mxu1 %v7420_v37 }
 0x15b   :  { %6805 = vmatprep.subr.bf16.mxu1 %v7194_v1 }
 0x15d   :  { %6195 = vmatmul.mubr.f32.vlgmr.msra.gmra.mrb[22].mxu1 %v1428_v60 }
 0x15e   :  { %6807 = vmatpush3.bf16.msra.mxu1 %v7428_v38  ;;  %6205 = vmatprep.mubr.msk.f32.mxu1 %vm7195_vm3, %v7196_v32 }
 0x15f   :  { %6808 = vmatprep.subr.bf16.mxu1 %v7194_v1 }
 0x162   :  { %6810 = vmatpush3.bf16.msra.mxu1 %v7433_v39 }
 0x163   :  { %6811 = vmatprep.subr.bf16.mxu1 %v7194_v1 }
 0x165   :  { %6206 = vmatmul.mubr.f32.vlgmr.msra.gmra.mrb[24].mxu1 %v1429_v61 }
 0x166   :  { %6813 = vmatpush3.bf16.msra.mxu1 %v7376_v12  ;;  %6216 = vmatprep.mubr.msk.f32.mxu1 %vm7195_vm3, %v7196_v32 }
 0x167   :  { %6814 = vmatprep.subr.bf16.mxu1 %v7194_v1 }
 0x16a   :  { %6816 = vmatpush3.bf16.msra.mxu1 %v7390_v11 }
 0x16b   :  { %6817 = vmatprep.subr.bf16.mxu1 %v7194_v1 }
 0x16d   :  { %6217 = vmatmul.mubr.f32.vlgmr.msra.gmra.mrb[26].mxu1 %v1430_v62 }
 0x16e   :  { %6819 = vmatpush3.bf16.msra.mxu1 %v7445_v40  ;;  %6227 = vmatprep.mubr.msk.f32.mxu1 %vm7195_vm3, %v7196_v32 }
 0x16f   :  { %6820 = vmatprep.subr.bf16.mxu1 %v7194_v1 }
 0x172   :  { %6822 = vmatpush3.bf16.msra.mxu1 %v7449_v41 }
 0x173   :  { %6823 = vmatprep.subr.bf16.mxu1 %v7194_v1 }
 0x175   :  { %6228 = vmatmul.mubr.f32.vlgmr.msra.gmra.mrb[28].mxu1 %v1428_v60 }
 0x176   :  { %6825 = vmatpush3.bf16.msra.mxu1 %v7376_v12  ;;  %6238 = vmatprep.mubr.msk.f32.mxu1 %vm7195_vm3, %v7196_v32 }
 0x177   :  { %6826 = vmatprep.subr.bf16.mxu1 %v7194_v1 }
 0x17a   :  { %6828 = vmatpush3.bf16.msra.mxu1 %v7390_v11 }
 0x17b   :  { %6835 = vmatprep.subr.bf16.mxu1 %v7194_v1 }
 0x17d   :  { %6239 = vmatmul.mubr.f32.vlgmr.msra.gmra.mrb[30].mxu1 %v1428_v60 }
 0x17e   :  { %6837 = vmatpush3.bf16.msra.mxu1 %v7417_v34  ;;  %6260 = vmatprep.mubr.msk.f32.mxu1 %vm7195_vm3, %v7196_v32 }
 0x17f   :  { %6838 = vmatprep.subr.bf16.mxu1 %v7194_v1 }
 0x182   :  { %6840 = vmatpush3.bf16.msra.mxu1 %v7420_v37 }
 0x183   :  { %6847 = vmatprep.subr.bf16.mxu1 %v7194_v1 }
 0x228   :  { %v1434_v2 = vpop.f32.mrb[20].mxu1 }
 0x229   :  { %v6185_v3 = vpop.f32.mrb[21].mxu1 }
 0x230   :  { %v1525_v4 = vpop.f32.mrb[22].mxu1 }
 0x231   :  { %v1526_v5 = vadd.f32 %v1525_v4, %v1434_v2  ;;  %v6196_v6 = vpop.f32.mrb[23].mxu1 }
 0x238   :  { %v1605_v7 = vpop.f32.mrb[24].mxu1 }
 0x239   :  { %v1606_v8 = vadd.f32 %v1605_v7, %v1526_v5  ;;  %v6207_v9 = vpop.f32.mrb[25].mxu1 }
 0x240   :  { %v1682_v13 = vpop.f32.mrb[26].mxu1 }
 0x241   :  { %v1683_v14 = vadd.f32 %v1682_v13, %v1606_v8  ;;  %v6218_v16 = vpop.f32.mrb[27].mxu1 }
 0x248   :  { %v1765_v10 = vpop.f32.mrb[28].mxu1 }
 0x249   :  { %v1766_v17 = vadd.f32 %v1765_v10, %v1683_v14  ;;  %v6229_v18 = vpop.f32.mrb[29].mxu1 }
 0x250   :  { %v1840_v19 = vpop.f32.mrb[30].mxu1 }
 0x251   :  { %v1841_v26 = vadd.f32 %v1840_v19, %v1766_v17  ;;  %v6240_v22 = vpop.f32.mrb[31].mxu1 }
 0x252   :  { %v2836_v22 = vld [vmem:[#allocation4 + $0x18] sm:$0xff] }
 0x253   :  { %v1848_v23 = vadd.f32 %v1847_v21, %v1841_v26 }
 0x255   :  { %7180 = vtanh.f32 %v1848_v23  ;;  %v2339_v52 = vmul.f32 0.8, %v1848_v23 }
 0x257   :  { %v2342_v58 = vadd.f32 %v2341_v56, %v2339_v52 }
 0x25f   :  { %v7181_v27 = vpop.eup %7180 }
 0x260   :  { %1850 = vst.msk [vmem:[#allocation4 + $0x8] sm:$0xff] %vm34_vm2, %v7181_v27  ;;  %v1852_v28 = vsel %vm34_vm2, %v7181_v27, 0 }
 0x261   :  { %v1923_v24 = vand.u32 4294901760, %v1852_v28 }
 0x263   :  { %v1924_v25 = vsub.f32 %v1852_v28, %v1923_v24  ;;  %6261 = vmatmul.mubr.f32.vlgmr.msra.gmra.mrb[32].mxu1 %v1923_v24 }
 0x264   :  { %6849 = vmatpush3.bf16.msra.mxu1 %v7376_v12  ;;  %6282 = vmatprep.mubr.msk.f32.mxu1 %vm7195_vm3, %v7196_v32 }
 0x265   :  { %6850 = vmatprep.subr.bf16.mxu1 %v7194_v1  ;;  %v1925_v29 = vand.u32 4294901760, %v1924_v25 }
 0x267   :  { %v1926_v30 = vsub.f32 %v1924_v25, %v1925_v29 }
 0x268   :  { %6852 = vmatpush3.bf16.msra.mxu1 %v7390_v11 }
 0x269   :  { %v1927_v31 = vand.u32 4294901760, %v1926_v30  ;;  %6859 = vmatprep.subr.bf16.mxu1 %v7194_v1 }
 0x26b   :  { %6283 = vmatmul.mubr.f32.vlgmr.msra.gmra.mrb[34].mxu1 %v1925_v29  ;;  %6250 = vmatmul.mubr.f32.vlgmr.msra.gmra.mrb[8].mxu0 %v1927_v31 }
 0x26c   :  { %6843 = vmatpush3.bf16.msra.mxu0 %v7428_v38  ;;  %6861 = vmatpush3.bf16.msra.mxu1 %v7376_v12 }
 0x26d   :  { %6844 = vmatprep.subr.bf16.mxu0 %v7194_v1  ;;  %6862 = vmatprep.subr.bf16.mxu1 %v7194_v1 }
 0x26e   :  { %6271 = vmatprep.mubr.msk.f32.mxu0 %vm7195_vm3, %v7196_v32  ;;  %6304 = vmatprep.mubr.msk.f32.mxu1 %vm7195_vm3, %v7196_v32 }
 0x270   :  { %6846 = vmatpush3.bf16.msra.mxu0 %v7433_v39  ;;  %6864 = vmatpush3.bf16.msra.mxu1 %v7390_v11 }
 0x271   :  { %6853 = vmatprep.subr.bf16.mxu0 %v7194_v1  ;;  %6871 = vmatprep.subr.bf16.mxu1 %v7194_v1 }
 0x273   :  { %6272 = vmatmul.mubr.f32.vlgmr.msra.gmra.mrb[10].mxu0 %v1924_v25  ;;  %6305 = vmatmul.mubr.f32.vlgmr.msra.gmra.mrb[36].mxu1 %v1923_v24 }
 0x274   :  { %6855 = vmatpush3.bf16.msra.mxu0 %v7445_v40  ;;  %6293 = vmatprep.mubr.msk.f32.mxu0 %vm7195_vm3, %v7196_v32 }
 0x275   :  { %6856 = vmatprep.subr.bf16.mxu0 %v7194_v1  ;;  %6873 = vmatpush3.bf16.msra.mxu1 %v7417_v34 }
 0x276   :  { %6874 = vmatprep.subr.bf16.mxu1 %v7194_v1  ;;  %6326 = vmatprep.mubr.msk.f32.mxu1 %vm7195_vm3, %v7196_v32 }
 0x278   :  { %6858 = vmatpush3.bf16.msra.mxu0 %v7449_v41 }
 0x279   :  { %6876 = vmatpush3.bf16.msra.mxu1 %v7420_v37  ;;  %6865 = vmatprep.subr.bf16.mxu0 %v7194_v1 }
 0x27a   :  { %6883 = vmatprep.subr.bf16.mxu1 %v7194_v1 }
 0x27b   :  { %6294 = vmatmul.mubr.f32.vlgmr.msra.gmra.mrb[12].mxu0 %v1923_v24 }
 0x27c   :  { %6867 = vmatpush3.bf16.msra.mxu0 %v7376_v12  ;;  %6315 = vmatprep.mubr.msk.f32.mxu0 %vm7195_vm3, %v7196_v32 }
 0x27d   :  { %6868 = vmatprep.subr.bf16.mxu0 %v7194_v1 }
 0x280   :  { %6870 = vmatpush3.bf16.msra.mxu0 %v7390_v11 }
 0x281   :  { %6877 = vmatprep.subr.bf16.mxu0 %v7194_v1 }
 0x336   :  { %v2020_v33 = vpop.f32.mrb[32].mxu1 }
 0x337   :  { %v6262_v35 = vpop.f32.mrb[33].mxu1 }
 0x33e   :  { %v2177_v36 = vpop.f32.mrb[34].mxu1  ;;  %v1929_v42 = vpop.f32.mrb[8].mxu0 }
 0x33f   :  { %v2021_v43 = vadd.f32 %v2020_v33, %v1929_v42  ;;  %v6284_v44 = vpop.f32.mrb[35].mxu1  ;;  %v6251_v45 = vpop.f32.mrb[9].mxu0 }
 0x346   :  { %v2100_v46 = vpop.f32.mrb[10].mxu0  ;;  %v2335_v47 = vpop.f32.mrb[36].mxu1 }
 0x347   :  { %v2101_v48 = vadd.f32 %v2100_v46, %v2021_v43  ;;  %v6273_v49 = vpop.f32.mrb[11].mxu0  ;;  %v6306_v50 = vpop.f32.mrb[37].mxu1 }
 0x349   :  { %v2178_v51 = vadd.f32 %v2177_v36, %v2101_v48 }
 0x34e   :  { %v2260_v53 = vpop.f32.mrb[12].mxu0 }
 0x34f   :  { %v2261_v54 = vadd.f32 %v2260_v53, %v2178_v51  ;;  %v6295_v55 = vpop.f32.mrb[13].mxu0 }
 0x351   :  { %v2336_v57 = vadd.f32 %v2335_v47, %v2261_v54 }
 0x353   :  { %v2343_v59 = vadd.f32 %v2342_v58, %v2336_v57  ;;  %v3331_v58 = vld [vmem:[#allocation4 + $0x20] sm:$0xff] }
 0x355   :  { %7182 = vtanh.f32 %v2343_v59  ;;  %v2834_v19 = vmul.f32 0.8, %v2343_v59 }
 0x357   :  { %v2837_v27 = vadd.f32 %v2836_v22, %v2834_v19 }
 0x35f   :  { %v7183_v60 = vpop.eup %7182 }
 0x360   :  { %2345 = vst.msk [vmem:[#allocation4 + $0x10] sm:$0xff] %vm34_vm2, %v7183_v60  ;;  %v2347_v61 = vsel %vm34_vm2, %v7183_v60, 0 }
 0x361   :  { %v2418_v62 = vand.u32 4294901760, %v2347_v61 }
 0x363   :  { %v2419_v63 = vsub.f32 %v2347_v61, %v2418_v62  ;;  %6327 = vmatmul.mubr.f32.vlgmr.msra.gmra.mrb[38].mxu1 %v2418_v62 }
 0x364   :  { %6885 = vmatpush3.bf16.msra.mxu1 %v7376_v12  ;;  %6348 = vmatprep.mubr.msk.f32.mxu1 %vm7195_vm3, %v7196_v32 }
 0x365   :  { %6886 = vmatprep.subr.bf16.mxu1 %v7194_v1  ;;  %v2420_v0 = vand.u32 4294901760, %v2419_v63 }
 0x367   :  { %v2421_v2 = vsub.f32 %v2419_v63, %v2420_v0 }
 0x368   :  { %6888 = vmatpush3.bf16.msra.mxu1 %v7390_v11 }
 0x369   :  { %6895 = vmatprep.subr.bf16.mxu1 %v7194_v1  ;;  %v2422_v3 = vand.u32 4294901760, %v2421_v2 }
 0x36b   :  { %6349 = vmatmul.mubr.f32.vlgmr.msra.gmra.mrb[40].mxu1 %v2420_v0  ;;  %6316 = vmatmul.mubr.f32.vlgmr.msra.gmra.mrb[14].mxu0 %v2422_v3 }
 0x36c   :  { %6879 = vmatpush3.bf16.msra.mxu0 %v7428_v38  ;;  %6897 = vmatpush3.bf16.msra.mxu1 %v7376_v12 }
 0x36d   :  { %6880 = vmatprep.subr.bf16.mxu0 %v7194_v1  ;;  %6898 = vmatprep.subr.bf16.mxu1 %v7194_v1 }
 0x36e   :  { %6337 = vmatprep.mubr.msk.f32.mxu0 %vm7195_vm3, %v7196_v32  ;;  %6370 = vmatprep.mubr.msk.f32.mxu1 %vm7195_vm3, %v7196_v32 }
 0x370   :  { %6882 = vmatpush3.bf16.msra.mxu0 %v7433_v39  ;;  %6900 = vmatpush3.bf16.msra.mxu1 %v7390_v11 }
 0x371   :  { %6889 = vmatprep.subr.bf16.mxu0 %v7194_v1  ;;  %6907 = vmatprep.subr.bf16.mxu1 %v7194_v1 }
 0x373   :  { %6338 = vmatmul.mubr.f32.vlgmr.msra.gmra.mrb[16].mxu0 %v2419_v63  ;;  %6371 = vmatmul.mubr.f32.vlgmr.msra.gmra.mrb[42].mxu1 %v2418_v62 }
 0x374   :  { %6891 = vmatpush3.bf16.msra.mxu0 %v7445_v40  ;;  %6359 = vmatprep.mubr.msk.f32.mxu0 %vm7195_vm3, %v7196_v32 }
 0x375   :  { %6892 = vmatprep.subr.bf16.mxu0 %v7194_v1  ;;  %6909 = vmatpush3.bf16.msra.mxu1 %v7417_v34 }
 0x376   :  { %6910 = vmatprep.subr.bf16.mxu1 %v7194_v1  ;;  %6392 = vmatprep.mubr.msk.f32.mxu1 %vm7195_vm3, %v7196_v32 }
 0x378   :  { %6894 = vmatpush3.bf16.msra.mxu0 %v7449_v41 }
 0x379   :  { %6912 = vmatpush3.bf16.msra.mxu1 %v7420_v37  ;;  %6901 = vmatprep.subr.bf16.mxu0 %v7194_v1 }
 0x37a   :  { %6919 = vmatprep.subr.bf16.mxu1 %v7194_v1 }
 0x37b   :  { %6360 = vmatmul.mubr.f32.vlgmr.msra.gmra.mrb[18].mxu0 %v2418_v62 }
 0x37c   :  { %6903 = vmatpush3.bf16.msra.mxu0 %v7376_v12  ;;  %6381 = vmatprep.mubr.msk.f32.mxu0 %vm7195_vm3, %v7196_v32 }
 0x37d   :  { %6904 = vmatprep.subr.bf16.mxu0 %v7194_v1 }
 0x380   :  { %6906 = vmatpush3.bf16.msra.mxu0 %v7390_v11 }
 0x381   :  { %6913 = vmatprep.subr.bf16.mxu0 %v7194_v1 }
 0x436   :  { %v2515_v4 = vpop.f32.mrb[38].mxu1 }
 0x437   :  { %v6328_v5 = vpop.f32.mrb[39].mxu1 }
 0x43e   :  { %v2672_v6 = vpop.f32.mrb[40].mxu1  ;;  %v2424_v7 = vpop.f32.mrb[14].mxu0 }
 0x43f   :  { %v2516_v8 = vadd.f32 %v2515_v4, %v2424_v7  ;;  %v6350_v9 = vpop.f32.mrb[41].mxu1  ;;  %v6317_v13 = vpop.f32.mrb[15].mxu0 }
 0x446   :  { %v2595_v14 = vpop.f32.mrb[16].mxu0  ;;  %v2830_v16 = vpop.f32.mrb[42].mxu1 }
 0x447   :  { %v2596_v10 = vadd.f32 %v2595_v14, %v2516_v8  ;;  %v6339_v17 = vpop.f32.mrb[17].mxu0  ;;  %v6372_v18 = vpop.f32.mrb[43].mxu1 }
 0x449   :  { %v2673_v15 = vadd.f32 %v2672_v6, %v2596_v10 }
 0x44e   :  { %v2755_v20 = vpop.f32.mrb[18].mxu0 }
 0x44f   :  { %v2756_v26 = vadd.f32 %v2755_v20, %v2673_v15  ;;  %v6361_v21 = vpop.f32.mrb[19].mxu0 }
 0x451   :  { %v2831_v23 = vadd.f32 %v2830_v16, %v2756_v26 }
 0x453   :  { %v2838_v28 = vadd.f32 %v2837_v27, %v2831_v23  ;;  %v3826_v27 = vld [vmem:[#allocation4 + $0x28] sm:$0xff] }
 0x455   :  { %7184 = vtanh.f32 %v2838_v28  ;;  %v3329_v54 = vmul.f32 0.8, %v2838_v28 }
 0x457   :  { %v3332_v60 = vadd.f32 %v3331_v58, %v3329_v54  ;;  %v4321_v58 = vld [vmem:[#allocation4 + $0x30] sm:$0xff] }
 0x45f   :  { %v7185_v24 = vpop.eup %7184 }
 0x460   :  { %2840 = vst.msk [vmem:[#allocation4 + $0x18] sm:$0xff] %vm34_vm2, %v7185_v24  ;;  %v2842_v25 = vsel %vm34_vm2, %v7185_v24, 0 }
 0x461   :  { %v2913_v29 = vand.u32 4294901760, %v2842_v25 }
 0x463   :  { %v2914_v30 = vsub.f32 %v2842_v25, %v2913_v29  ;;  %6393 = vmatmul.mubr.f32.vlgmr.msra.gmra.mrb[44].mxu1 %v2913_v29 }
 0x464   :  { %6921 = vmatpush3.bf16.msra.mxu1 %v7376_v12  ;;  %6414 = vmatprep.mubr.msk.f32.mxu1 %vm7195_vm3, %v7196_v32 }
 0x465   :  { %6922 = vmatprep.subr.bf16.mxu1 %v7194_v1  ;;  %v2915_v31 = vand.u32 4294901760, %v2914_v30 }
 0x467   :  { %v2916_v33 = vsub.f32 %v2914_v30, %v2915_v31 }
 0x468   :  { %6924 = vmatpush3.bf16.msra.mxu1 %v7390_v11 }
 0x469   :  { %6931 = vmatprep.subr.bf16.mxu1 %v7194_v1  ;;  %v2917_v35 = vand.u32 4294901760, %v2916_v33 }
 0x46b   :  { %6415 = vmatmul.mubr.f32.vlgmr.msra.gmra.mrb[46].mxu1 %v2915_v31  ;;  %6382 = vmatmul.mubr.f32.vlgmr.msra.gmra.mrb[20].mxu0 %v2917_v35 }
 0x46c   :  { %6915 = vmatpush3.bf16.msra.mxu0 %v7428_v38  ;;  %6933 = vmatpush3.bf16.msra.mxu1 %v7376_v12 }
 0x46d   :  { %6916 = vmatprep.subr.bf16.mxu0 %v7194_v1  ;;  %6934 = vmatprep.subr.bf16.mxu1 %v7194_v1 }
 0x46e   :  { %6403 = vmatprep.mubr.msk.f32.mxu0 %vm7195_vm3, %v7196_v32  ;;  %6436 = vmatprep.mubr.msk.f32.mxu1 %vm7195_vm3, %v7196_v32 }
 0x470   :  { %6918 = vmatpush3.bf16.msra.mxu0 %v7433_v39  ;;  %6936 = vmatpush3.bf16.msra.mxu1 %v7390_v11 }
 0x471   :  { %6925 = vmatprep.subr.bf16.mxu0 %v7194_v1  ;;  %6943 = vmatprep.subr.bf16.mxu1 %v7194_v1 }
 0x473   :  { %6404 = vmatmul.mubr.f32.vlgmr.msra.gmra.mrb[22].mxu0 %v2914_v30  ;;  %6437 = vmatmul.mubr.f32.vlgmr.msra.gmra.mrb[48].mxu1 %v2913_v29 }
 0x474   :  { %6927 = vmatpush3.bf16.msra.mxu0 %v7445_v40  ;;  %6425 = vmatprep.mubr.msk.f32.mxu0 %vm7195_vm3, %v7196_v32 }
 0x475   :  { %6928 = vmatprep.subr.bf16.mxu0 %v7194_v1  ;;  %6945 = vmatpush3.bf16.msra.mxu1 %v7417_v34 }
 0x476   :  { %6946 = vmatprep.subr.bf16.mxu1 %v7194_v1  ;;  %6458 = vmatprep.mubr.msk.f32.mxu1 %vm7195_vm3, %v7196_v32 }
 0x478   :  { %6930 = vmatpush3.bf16.msra.mxu0 %v7449_v41 }
 0x479   :  { %6948 = vmatpush3.bf16.msra.mxu1 %v7420_v37  ;;  %6937 = vmatprep.subr.bf16.mxu0 %v7194_v1 }
 0x47a   :  { %6955 = vmatprep.subr.bf16.mxu1 %v7194_v1 }
 0x47b   :  { %6426 = vmatmul.mubr.f32.vlgmr.msra.gmra.mrb[24].mxu0 %v2913_v29 }
 0x47c   :  { %6939 = vmatpush3.bf16.msra.mxu0 %v7376_v12  ;;  %6447 = vmatprep.mubr.msk.f32.mxu0 %vm7195_vm3, %v7196_v32 }
 0x47d   :  { %6940 = vmatprep.subr.bf16.mxu0 %v7194_v1 }
 0x480   :  { %6942 = vmatpush3.bf16.msra.mxu0 %v7390_v11 }
 0x481   :  { %6949 = vmatprep.subr.bf16.mxu0 %v7194_v1 }
 0x536   :  { %v3010_v36 = vpop.f32.mrb[44].mxu1 }
 0x537   :  { %v6394_v42 = vpop.f32.mrb[45].mxu1 }
 0x53e   :  { %v3167_v43 = vpop.f32.mrb[46].mxu1  ;;  %v2919_v44 = vpop.f32.mrb[20].mxu0 }
 0x53f   :  { %v3011_v45 = vadd.f32 %v3010_v36, %v2919_v44  ;;  %v6416_v46 = vpop.f32.mrb[47].mxu1  ;;  %v6383_v47 = vpop.f32.mrb[21].mxu0 }
 0x546   :  { %v3090_v48 = vpop.f32.mrb[22].mxu0  ;;  %v3325_v49 = vpop.f32.mrb[48].mxu1 }
 0x547   :  { %v3091_v50 = vadd.f32 %v3090_v48, %v3011_v45  ;;  %v6405_v51 = vpop.f32.mrb[23].mxu0  ;;  %v6438_v52 = vpop.f32.mrb[49].mxu1 }
 0x549   :  { %v3168_v53 = vadd.f32 %v3167_v43, %v3091_v50 }
 0x54e   :  { %v3250_v55 = vpop.f32.mrb[24].mxu0 }
 0x54f   :  { %v3251_v56 = vadd.f32 %v3250_v55, %v3168_v53  ;;  %v6427_v57 = vpop.f32.mrb[25].mxu0 }
 0x551   :  { %v3326_v59 = vadd.f32 %v3325_v49, %v3251_v56 }
 0x553   :  { %v3333_v61 = vadd.f32 %v3332_v60, %v3326_v59 }
 0x555   :  { %7186 = vtanh.f32 %v3333_v61  ;;  %v3824_v26 = vmul.f32 0.8, %v3333_v61 }
 0x557   :  { %v3827_v24 = vadd.f32 %v3826_v27, %v3824_v26 }
 0x55f   :  { %v7187_v62 = vpop.eup %7186 }
 0x560   :  { %3335 = vst.msk [vmem:[#allocation4 + $0x20] sm:$0xff] %vm34_vm2, %v7187_v62  ;;  %v3337_v63 = vsel %vm34_vm2, %v7187_v62, 0 }
 0x561   :  { %v3408_v0 = vand.u32 4294901760, %v3337_v63 }
 0x563   :  { %v3409_v2 = vsub.f32 %v3337_v63, %v3408_v0  ;;  %6459 = vmatmul.mubr.f32.vlgmr.msra.gmra.mrb[50].mxu1 %v3408_v0 }
 0x564   :  { %6957 = vmatpush3.bf16.msra.mxu1 %v7376_v12  ;;  %6480 = vmatprep.mubr.msk.f32.mxu1 %vm7195_vm3, %v7196_v32 }
 0x565   :  { %6958 = vmatprep.subr.bf16.mxu1 %v7194_v1  ;;  %v3410_v3 = vand.u32 4294901760, %v3409_v2 }
 0x567   :  { %v3411_v4 = vsub.f32 %v3409_v2, %v3410_v3 }
 0x568   :  { %6960 = vmatpush3.bf16.msra.mxu1 %v7390_v11 }
 0x569   :  { %6967 = vmatprep.subr.bf16.mxu1 %v7194_v1  ;;  %v3412_v5 = vand.u32 4294901760, %v3411_v4 }
 0x56b   :  { %6481 = vmatmul.mubr.f32.vlgmr.msra.gmra.mrb[52].mxu1 %v3410_v3  ;;  %6448 = vmatmul.mubr.f32.vlgmr.msra.gmra.mrb[26].mxu0 %v3412_v5  ;;  %v4823_v3 = vld [vmem:[#allocation4] sm:$0xff] }
 0x56c   :  { %6951 = vmatpush3.bf16.msra.mxu0 %v7428_v38  ;;  %6969 = vmatpush3.bf16.msra.mxu1 %v7376_v12 }
 0x56d   :  { %6952 = vmatprep.subr.bf16.mxu0 %v7194_v1  ;;  %6970 = vmatprep.subr.bf16.mxu1 %v7194_v1 }
 0x56e   :  { %6469 = vmatprep.mubr.msk.f32.mxu0 %vm7195_vm3, %v7196_v32  ;;  %6502 = vmatprep.mubr.msk.f32.mxu1 %vm7195_vm3, %v7196_v32 }
 0x570   :  { %6954 = vmatpush3.bf16.msra.mxu0 %v7433_v39  ;;  %6972 = vmatpush3.bf16.msra.mxu1 %v7390_v11 }
 0x571   :  { %6961 = vmatprep.subr.bf16.mxu0 %v7194_v1  ;;  %6979 = vmatprep.subr.bf16.mxu1 %v7194_v1 }
 0x573   :  { %6470 = vmatmul.mubr.f32.vlgmr.msra.gmra.mrb[28].mxu0 %v3409_v2  ;;  %6503 = vmatmul.mubr.f32.vlgmr.msra.gmra.mrb[54].mxu1 %v3408_v0 }
 0x574   :  { %6963 = vmatpush3.bf16.msra.mxu0 %v7445_v40  ;;  %6491 = vmatprep.mubr.msk.f32.mxu0 %vm7195_vm3, %v7196_v32 }
 0x575   :  { %6964 = vmatprep.subr.bf16.mxu0 %v7194_v1  ;;  %6981 = vmatpush3.bf16.msra.mxu1 %v7417_v34 }
 0x576   :  { %6982 = vmatprep.subr.bf16.mxu1 %v7194_v1  ;;  %6524 = vmatprep.mubr.msk.f32.mxu1 %vm7195_vm3, %v7196_v32 }
 0x578   :  { %6966 = vmatpush3.bf16.msra.mxu0 %v7449_v41 }
 0x579   :  { %6984 = vmatpush3.bf16.msra.mxu1 %v7420_v37  ;;  %6973 = vmatprep.subr.bf16.mxu0 %v7194_v1 }
 0x57a   :  { %6991 = vmatprep.subr.bf16.mxu1 %v7194_v1 }
 0x57b   :  { %6492 = vmatmul.mubr.f32.vlgmr.msra.gmra.mrb[30].mxu0 %v3408_v0 }
 0x57c   :  { %6975 = vmatpush3.bf16.msra.mxu0 %v7376_v12  ;;  %6513 = vmatprep.mubr.msk.f32.mxu0 %vm7195_vm3, %v7196_v32 }
 0x57d   :  { %6976 = vmatprep.subr.bf16.mxu0 %v7194_v1 }
 0x580   :  { %6978 = vmatpush3.bf16.msra.mxu0 %v7390_v11 }
 0x581   :  { %6985 = vmatprep.subr.bf16.mxu0 %v7194_v1 }
 0x636   :  { %v3505_v6 = vpop.f32.mrb[50].mxu1 }
 0x637   :  { %v6460_v7 = vpop.f32.mrb[51].mxu1 }
 0x63e   :  { %v3662_v8 = vpop.f32.mrb[52].mxu1  ;;  %v3414_v9 = vpop.f32.mrb[26].mxu0 }
 0x63f   :  { %v3506_v13 = vadd.f32 %v3505_v6, %v3414_v9  ;;  %v6482_v14 = vpop.f32.mrb[53].mxu1  ;;  %v6449_v16 = vpop.f32.mrb[27].mxu0  ;;  %v4836_v6 = vsel %vm34_vm2, %v4823_v3, 0  ;;  %v4824_v9 = vld [vmem:[#allocation4 + $0x8] sm:$0xff] }
 0x640   :  { %v4839_v14 = vsel %vm34_vm2, %v4824_v9, 0  ;;  %v7760_v16 = vld [vmem:[%s7973_s4] sm:$0xff] }
 0x646   :  { %v3585_v10 = vpop.f32.mrb[28].mxu0  ;;  %v3820_v17 = vpop.f32.mrb[54].mxu1 }
 0x647   :  { %v3586_v18 = vadd.f32 %v3585_v10, %v3506_v13  ;;  %v6471_v15 = vpop.f32.mrb[29].mxu0  ;;  %v6504_v19 = vpop.f32.mrb[55].mxu1  ;;  %v4825_v13 = vld [vmem:[#allocation4 + $0x10] sm:$0xff] }
 0x648   :  { %v4842_v10 = vsel %vm34_vm2, %v4825_v13, 0  ;;  %v4827_v15 = vld [vmem:[#allocation4 + $0x20] sm:$0xff]  ;;  %v4860_v19 = vand.u32 4294901760, %v7760_v16 }
 0x649   :  { %v3663_v20 = vadd.f32 %v3662_v8, %v3586_v18  ;;  %v7746_v8 = vand.u32 4294901760, %v4836_v6  ;;  %v7773_v18 = vand.u32 4294901760, %v4839_v14 }
 0x64e   :  { %v3745_v21 = vpop.f32.mrb[30].mxu0 }
 0x64f   :  { %v3746_v22 = vadd.f32 %v3745_v21, %v3663_v20  ;;  %v6493_v23 = vpop.f32.mrb[31].mxu0  ;;  %v7782_v21 = vld [vmem:[%s7973_s4 + $0x10] sm:$0xff] }
 0x650   :  { %v4848_v23 = vsel %vm34_vm2, %v4827_v15, 0 }
 0x651   :  { %v3821_v28 = vadd.f32 %v3820_v17, %v3746_v22  ;;  %v4826_v17 = vld [vmem:[#allocation4 + $0x18] sm:$0xff] }
 0x652   :  { %v4845_v22 = vsel %vm34_vm2, %v4826_v17, 0 }
 0x653   :  { %v3828_v25 = vadd.f32 %v3827_v24, %v3821_v28  ;;  %v7798_v28 = vsub.f32 %v4839_v14, %v7773_v18 }
 0x655   :  { %7188 = vtanh.f32 %v3828_v25  ;;  %v4319_v54 = vmul.f32 0.8, %v3828_v25 }
 0x657   :  { %v4322_v60 = vadd.f32 %v4321_v58, %v4319_v54 }
 0x65f   :  { %v7189_v29 = vpop.eup %7188 }
 0x660   :  { %3830 = vst.msk [vmem:[#allocation4 + $0x28] sm:$0xff] %vm34_vm2, %v7189_v29  ;;  %v3832_v30 = vsel %vm34_vm2, %v7189_v29, 0  ;;  %v4866_v29 = vand.u32 4294901760, %v7782_v21 }
 0x661   :  { %v3903_v31 = vand.u32 4294901760, %v3832_v30 }
 0x663   :  { %v3904_v33 = vsub.f32 %v3832_v30, %v3903_v31  ;;  %6525 = vmatmul.mubr.f32.vlgmr.msra.gmra.mrb[56].mxu1 %v3903_v31 }
 0x664   :  { %6993 = vmatpush3.bf16.msra.mxu1 %v7376_v12  ;;  %6546 = vmatprep.mubr.msk.f32.mxu1 %vm7195_vm3, %v7196_v32 }
 0x665   :  { %6994 = vmatprep.subr.bf16.mxu1 %v7194_v1  ;;  %v3905_v35 = vand.u32 4294901760, %v3904_v33 }
 0x667   :  { %v3906_v36 = vsub.f32 %v3904_v33, %v3905_v35  ;;  %v4828_v27 = vld [vmem:[#allocation4 + $0x28] sm:$0xff] }
 0x668   :  { %6996 = vmatpush3.bf16.msra.mxu1 %v7390_v11 }
 0x669   :  { %7003 = vmatprep.subr.bf16.mxu1 %v7194_v1  ;;  %v3907_v42 = vand.u32 4294901760, %v3906_v36 }
 0x66b   :  { %6547 = vmatmul.mubr.f32.vlgmr.msra.gmra.mrb[58].mxu1 %v3905_v35  ;;  %6514 = vmatmul.mubr.f32.vlgmr.msra.gmra.mrb[32].mxu0 %v3907_v42  ;;  %v4940_v42 = vand.u32 4294901760, %v7798_v28 }
 0x66c   :  { %6987 = vmatpush3.bf16.msra.mxu0 %v7428_v38  ;;  %7005 = vmatpush3.bf16.msra.mxu1 %v7376_v12 }
 0x66d   :  { %6988 = vmatprep.subr.bf16.mxu0 %v7194_v1  ;;  %7006 = vmatprep.subr.bf16.mxu1 %v7194_v1 }
 0x66e   :  { %6535 = vmatprep.mubr.msk.f32.mxu0 %vm7195_vm3, %v7196_v32  ;;  %6568 = vmatprep.mubr.msk.f32.mxu1 %vm7195_vm3, %v7196_v32 }
 0x670   :  { %6990 = vmatpush3.bf16.msra.mxu0 %v7433_v39  ;;  %7008 = vmatpush3.bf16.msra.mxu1 %v7390_v11 }
 0x671   :  { %6997 = vmatprep.subr.bf16.mxu0 %v7194_v1  ;;  %7015 = vmatprep.subr.bf16.mxu1 %v7194_v1 }
 0x673   :  { %6536 = vmatmul.mubr.f32.vlgmr.msra.gmra.mrb[34].mxu0 %v3904_v33  ;;  %6569 = vmatmul.mubr.f32.vlgmr.msra.gmra.mrb[60].mxu1 %v3903_v31  ;;  %v4851_v33 = vsel %vm34_vm2, %v4828_v27, 0 }
 0x674   :  { %6999 = vmatpush3.bf16.msra.mxu0 %v7445_v40  ;;  %6557 = vmatprep.mubr.msk.f32.mxu0 %vm7195_vm3, %v7196_v32 }
 0x675   :  { %7000 = vmatprep.subr.bf16.mxu0 %v7194_v1  ;;  %7017 = vmatpush3.bf16.msra.mxu1 %v7417_v34 }
 0x676   :  { %7018 = vmatprep.subr.bf16.mxu1 %v7194_v1  ;;  %6590 = vmatprep.mubr.msk.f32.mxu1 %vm7195_vm3, %v7196_v32 }
 0x678   :  { %7002 = vmatpush3.bf16.msra.mxu0 %v7449_v41 }
 0x679   :  { %7020 = vmatpush3.bf16.msra.mxu1 %v7420_v37  ;;  %7009 = vmatprep.subr.bf16.mxu0 %v7194_v1 }
 0x67a   :  { %7027 = vmatprep.subr.bf16.mxu1 %v7194_v1 }
 0x67b   :  { %6558 = vmatmul.mubr.f32.vlgmr.msra.gmra.mrb[36].mxu0 %v3903_v31 }
 0x67c   :  { %7011 = vmatpush3.bf16.msra.mxu0 %v7376_v12  ;;  %6579 = vmatprep.mubr.msk.f32.mxu0 %vm7195_vm3, %v7196_v32 }
 0x67d   :  { %7012 = vmatprep.subr.bf16.mxu0 %v7194_v1 }
 0x680   :  { %7014 = vmatpush3.bf16.msra.mxu0 %v7390_v11 }
 0x681   :  { %7021 = vmatprep.subr.bf16.mxu0 %v7194_v1 }
 0x736   :  { %v4000_v34 = vpop.f32.mrb[56].mxu1 }
 0x737   :  { %v6526_v43 = vpop.f32.mrb[57].mxu1 }
 0x738   :  { %v7829_v43 = vand.u32 4294901760, %v4851_v33 }
 0x73e   :  { %v4157_v44 = vpop.f32.mrb[58].mxu1  ;;  %v3909_v37 = vpop.f32.mrb[32].mxu0 }
 0x73f   :  { %v4001_v45 = vadd.f32 %v4000_v34, %v3909_v37  ;;  %v6548_v46 = vpop.f32.mrb[59].mxu1  ;;  %v6515_v47 = vpop.f32.mrb[33].mxu0 }
 0x746   :  { %v4080_v48 = vpop.f32.mrb[34].mxu0  ;;  %v4315_v49 = vpop.f32.mrb[60].mxu1 }
 0x747   :  { %v4081_v50 = vadd.f32 %v4080_v48, %v4001_v45  ;;  %v6537_v51 = vpop.f32.mrb[35].mxu0  ;;  %v6570_v52 = vpop.f32.mrb[61].mxu1  ;;  %v7845_v48 = vsub.f32 %v4851_v33, %v7829_v43 }
 0x749   :  { %v4158_v53 = vadd.f32 %v4157_v44, %v4081_v50  ;;  %v4980_v54 = vand.u32 4294901760, %v7845_v48 }
 0x74e   :  { %v4240_v55 = vpop.f32.mrb[36].mxu0 }
 0x74f   :  { %v4241_v56 = vadd.f32 %v4240_v55, %v4158_v53  ;;  %v6559_v57 = vpop.f32.mrb[37].mxu0 }
 0x751   :  { %v4316_v59 = vadd.f32 %v4315_v49, %v4241_v56 }
 0x753   :  { %v7730_v61 = vadd.f32 %v4322_v60, %v4316_v59  ;;  %v4981_v59 = vsub.f32 %v7845_v48, %v4980_v54 }
 0x755   :  { %7190 = vtanh.f32 %v7730_v61 }
 0x75f   :  { %v7191_v62 = vpop.eup %7190 }
 0x760   :  { %4325 = vst.msk [vmem:[#allocation4 + $0x30] sm:$0xff] %vm34_vm2, %v7191_v62  ;;  %v4327_v63 = vsel %vm34_vm2, %v7191_v62, 0 }
 0x761   :  { %v7735_v0 = vand.u32 4294901760, %v4327_v63 }
 0x763   :  { %v4399_v2 = vsub.f32 %v4327_v63, %v7735_v0  ;;  %6591 = vmatmul.mubr.f32.vlgmr.msra.gmra.mrb[62].mxu1 %v7735_v0  ;;  %v4982_v63 = vand.u32 4294901760, %v4981_v59  ;;  %v4814_v59 = vmul.f32 0.8, %v7730_v61 }
 0x764   :  { %7029 = vmatpush3.bf16.msra.mxu1 %v7376_v12  ;;  %6612 = vmatprep.mubr.msk.f32.mxu1 %vm7195_vm3, %v7196_v32 }
 0x765   :  { %7030 = vmatprep.subr.bf16.mxu1 %v7194_v1  ;;  %v4400_v4 = vand.u32 4294901760, %v4399_v2 }
 0x767   :  { %v4401_v5 = vsub.f32 %v4399_v2, %v4400_v4  ;;  %v4829_v24 = vld [vmem:[#allocation4 + $0x30] sm:$0xff] }
 0x768   :  { %7032 = vmatpush3.bf16.msra.mxu1 %v7390_v11  ;;  %v4854_v35 = vsel %vm34_vm2, %v4829_v24, 0 }
 0x769   :  { %7039 = vmatprep.subr.bf16.mxu1 %v7194_v1  ;;  %v4402_v7 = vand.u32 4294901760, %v4401_v5  ;;  %v7835_v46 = vand.u32 4294901760, %v4854_v35 }
 0x76b   :  { %6613 = vmatmul.mubr.f32.vlgmr.msra.gmra.mrb[64].mxu1 %v4400_v4  ;;  %6580 = vmatmul.mubr.f32.vlgmr.msra.gmra.mrb[38].mxu0 %v4402_v7  ;;  %v7852_v51 = vsub.f32 %v4854_v35, %v7835_v46  ;;  %v5024_v4 = vsub.f32 %v7782_v21, %v4866_v29 }
 0x76c   :  { %7023 = vmatpush3.bf16.msra.mxu0 %v7428_v38  ;;  %7041 = vmatpush3.bf16.msra.mxu1 %v7376_v12  ;;  %v7765_v12 = vld [vmem:[%s7973_s4 + $0x8] sm:$0xff]  ;;  %v7768_v38 = vsub.f32 %v4836_v6, %v7746_v8 }
 0x76d   :  { %7024 = vmatprep.subr.bf16.mxu0 %v7194_v1  ;;  %7042 = vmatprep.subr.bf16.mxu1 %v7194_v1  ;;  %v4863_v20 = vand.u32 4294901760, %v7765_v12  ;;  %v4990_v57 = vand.u32 4294901760, %v7852_v51  ;;  %v5025_v9 = vand.u32 4294901760, %v5024_v4 }
 0x76e   :  { %6601 = vmatprep.mubr.msk.f32.mxu0 %vm7195_vm3, %v7196_v32  ;;  %6634 = vmatprep.mubr.msk.f32.mxu1 %vm7195_vm3, %v7196_v32  ;;  %v4930_v26 = vand.u32 4294901760, %v7768_v38 }
 0x76f   :  { %v7805_v25 = vpack.c.bf16 %v4863_v20, %v4860_v19  ;;  %v4991_v62 = vsub.f32 %v7852_v51, %v4990_v57  ;;  %v5017_v3 = vsub.f32 %v7765_v12, %v4863_v20  ;;  %v5026_v17 = vsub.f32 %v5024_v4, %v5025_v9 }
 0x770   :  { %7026 = vmatpush3.bf16.msra.mxu0 %v7433_v39  ;;  %7044 = vmatpush3.bf16.msra.mxu1 %v7390_v11  ;;  %v7787_v11 = vld [vmem:[%s7973_s4 + $0x18] sm:$0xff]  ;;  %v7789_v39 = vand.u32 4294901760, %v4842_v10 }
 0x771   :  { %7033 = vmatprep.subr.bf16.mxu0 %v7194_v1  ;;  %v4869_v30 = vand.u32 4294901760, %v7787_v11  ;;  %v5018_v7 = vand.u32 4294901760, %v5017_v3  ;;  %v5027_v27 = vand.u32 4294901760, %v5026_v17 }
 0x772   :  { %v7815_v31 = vsub.f32 %v4842_v10, %v7789_v39 }
 0x773   :  { %6602 = vmatmul.mubr.f32.vlgmr.msra.gmra.mrb[40].mxu0 %v4399_v2  ;;  %6635 = vmatmul.mubr.f32.vlgmr.msra.gmra.mrb[66].mxu1 %v7735_v0  ;;  %v7823_v36 = vpack.c.bf16 %v4869_v30, %v4866_v29  ;;  %v5010_v2 = vsub.f32 %v7760_v16, %v4860_v19  ;;  %v5031_v5 = vsub.f32 %v7787_v11, %v4869_v30 }
 0x774   :  { %7035 = vmatpush3.bf16.msra.mxu0 %v7445_v40  ;;  %6623 = vmatprep.mubr.msk.f32.mxu0 %vm7195_vm3, %v7196_v32  ;;  %v7809_v40 = vand.u32 4294901760, %v4845_v22  ;;  %v4931_v32 = vsub.f32 %v7768_v38, %v4930_v26  ;;  %v4950_v37 = vand.u32 4294901760, %v7815_v31  ;;  %v5019_v10 = vsub.f32 %v5017_v3, %v5018_v7 }
 0x775   :  { %7036 = vmatprep.subr.bf16.mxu0 %v7194_v1  ;;  %v7817_v1 = vand.u32 4294901760, %v4848_v23  ;;  %v5011_v6 = vand.u32 4294901760, %v5010_v2  ;;  %v5032_v13 = vand.u32 4294901760, %v5031_v5  ;;  %v7061_v12 = vpack.c.bf16 %v5017_v3, %v5010_v2 }
 0x776   :  { %v7827_v34 = vsub.f32 %v4845_v22, %v7809_v40  ;;  %v4932_v44 = vand.u32 4294901760, %v4931_v32  ;;  %v4951_v49 = vsub.f32 %v7815_v31, %v4950_v37  ;;  %v7065_v20 = vpack.c.bf16 %v5031_v5, %v5024_v4 }
 0x777   :  { %v7833_v45 = vsub.f32 %v4848_v23, %v7817_v1  ;;  %v5012_v14 = vsub.f32 %v5010_v2, %v5011_v6  ;;  %v5033_v15 = vsub.f32 %v5031_v5, %v5032_v13  ;;  %v5020_v23 = vand.u32 4294901760, %v5019_v10 }
 0x778   :  { %7038 = vmatpush3.bf16.msra.mxu0 %v7449_v41  ;;  %v4941_v41 = vsub.f32 %v7798_v28, %v4940_v42  ;;  %v4960_v47 = vand.u32 4294901760, %v7827_v34  ;;  %v4952_v55 = vand.u32 4294901760, %v4951_v49  ;;  %v7077_v21 = vpack.c.bf16 %v5018_v7, %v5011_v6 }
 0x779   :  { %7046 = vmatprep.subr.bf16.mxu0 %v7805_v25  ;;  %v4970_v50 = vand.u32 4294901760, %v7833_v45  ;;  %v5013_v22 = vand.u32 4294901760, %v5012_v14  ;;  %v5034_v16 = vand.u32 4294901760, %v5033_v15  ;;  %v7877_v11 = vpack.c.bf16 %v5032_v13, %v5025_v9 }
 0x77a   :  { %v4942_v52 = vand.u32 4294901760, %v4941_v41  ;;  %v4961_v53 = vsub.f32 %v7827_v34, %v4960_v47 }
 0x77b   :  { %6624 = vmatmul.mubr.f32.vlgmr.msra.gmra.mrb[42].mxu0 %v7735_v0  ;;  %v4971_v56 = vsub.f32 %v7833_v45, %v4970_v50  ;;  %v4992_v0 = vand.u32 4294901760, %v4991_v62  ;;  %v7053_v19 = vpack.c.bf16 %v5020_v23, %v5013_v22  ;;  %v7057_v24 = vpack.c.bf16 %v5034_v16, %v5027_v27 }
 0x77c   :  { %7048 = vmatpush3.bf16.msra.mxu0 %v7805_v25  ;;  %6645 = vmatprep.mubr.f32.mxu0 %v4932_v44  ;;  %v4962_v58 = vand.u32 4294901760, %v4961_v53 }
 0x77d   :  { %7050 = vmatprep.subr.bf16.mxu0 %v7823_v36  ;;  %v4972_v60 = vand.u32 4294901760, %v4971_v56 }
 0x780   :  { %7052 = vmatpush3.bf16.msra.mxu0 %v7823_v36 }
 0x781   :  { %7054 = vmatprep.subr.bf16.mxu0 %v7053_v19 }
 0x783   :  { %6646 = vmatmul.mubr.f32.vlgmr.msra.gmra.mrb[44].mxu0 %v4942_v52 }
 0x784   :  { %6648 = vmatprep.mubr.f32.mxu0 %v4952_v55  ;;  %7056 = vmatpush3.bf16.msra.mxu0 %v7053_v19 }
 0x785   :  { %7058 = vmatprep.subr.bf16.mxu0 %v7057_v24 }
 0x787   :  { %6649 = vmatmul.mubr.f32.gmra.mrb[46].mxu0 %v4962_v58 }
 0x788   :  { %6651 = vmatprep.mubr.f32.mxu0 %v4972_v60  ;;  %7060 = vmatpush3.bf16.msra.mxu0 %v7057_v24 }
 0x789   :  { %7062 = vmatprep.subr.bf16.mxu0 %v7061_v12 }
 0x78b   :  { %6652 = vmatmul.mubr.f32.gmra.mrb[48].mxu0 %v4982_v63 }
 0x78c   :  { %6654 = vmatprep.mubr.f32.mxu0 %v4992_v0  ;;  %v4816_v0 = vld [vmem:[#allocation4 + $0x38] sm:$0xff] }
 0x78d   :  { %v4817_v3 = vadd.f32 %v4816_v0, %v4814_v59 }
 0x836   :  { %v4495_v29 = vpop.f32.mrb[62].mxu1 }
 0x837   :  { %v6592_v30 = vpop.f32.mrb[63].mxu1 }
 0x83e   :  { %v4652_v32 = vpop.f32.mrb[64].mxu1  ;;  %v4404_v33 = vpop.f32.mrb[38].mxu0 }
 0x83f   :  { %v4496_v35 = vadd.f32 %v4495_v29, %v4404_v33  ;;  %v6614_v44 = vpop.f32.mrb[65].mxu1  ;;  %v6581_v41 = vpop.f32.mrb[39].mxu0 }
 0x846   :  { %v4575_v49 = vpop.f32.mrb[40].mxu0  ;;  %v4810_v52 = vpop.f32.mrb[66].mxu1 }
 0x847   :  { %v4576_v53 = vadd.f32 %v4575_v49, %v4496_v35  ;;  %v6603_v55 = vpop.f32.mrb[41].mxu0  ;;  %v6636_v56 = vpop.f32.mrb[67].mxu1 }
 0x849   :  { %v4653_v58 = vadd.f32 %v4652_v32, %v4576_v53 }
 0x84e   :  { %v4735_v60 = vpop.f32.mrb[42].mxu0 }
 0x84f   :  { %v4736_v62 = vadd.f32 %v4735_v60, %v4653_v58  ;;  %v6625_v63 = vpop.f32.mrb[43].mxu0 }
 0x851   :  { %v4811_v2 = vadd.f32 %v4810_v52, %v4736_v62 }
 0x853   :  { %v4818_v4 = vadd.f32 %v4817_v3, %v4811_v2 }
 0x855   :  { %7192 = vtanh.f32 %v4818_v4  ;;  %4821 = vst.msk [vmem:[#allocation2] sm:$0xff] %vm34_vm2, %v4818_v4 }
 0x85f   :  { %v7193_v5 = vpop.eup %7192 }
 0x860   :  { %4820 = vst.msk [vmem:[#allocation4 + $0x38] sm:$0xff] %vm34_vm2, %v7193_v5  ;;  %4822 = vst.msk [vmem:[#allocation3] sm:$0xff] %vm34_vm2, %v7193_v5 }
 0x867   :  { %v4830_v6 = vld [vmem:[#allocation4 + $0x38] sm:$0xff] }
 0x868   :  { %v4857_v7 = vsel %vm34_vm2, %v4830_v6, 0 }
 0x869   :  { %v4998_v9 = vand.u32 4294901760, %v4857_v7 }
 0x86b   :  { %v4999_v61 = vsub.f32 %v4857_v7, %v4998_v9 }
 0x86d   :  { %v5000_v13 = vand.u32 4294901760, %v4999_v61 }
 0x86f   :  { %v5001_v14 = vsub.f32 %v4999_v61, %v5000_v13 }
 0x871   :  { %v5002_v10 = vand.u32 4294901760, %v5001_v14 }
 0x873   :  { %6655 = vmatmul.mubr.f32.gmra.mrb[50].mxu0 %v5002_v10 }
 0x874   :  { %6665 = vmatprep.mubr.f32.mxu0 %v7746_v8 }
 0x877   :  { %6666 = vmatmul.mubr.f32.vlgmr.msra.gmra.mrb[44].mxu0 %v7773_v18 }
 0x878   :  { %7064 = vmatpush3.bf16.msra.mxu0 %v7061_v12  ;;  %6668 = vmatprep.mubr.f32.mxu0 %v7789_v39 }
 0x879   :  { %7066 = vmatprep.subr.bf16.mxu0 %v7065_v20 }
 0x87b   :  { %6669 = vmatmul.mubr.f32.gmra.mrb[46].mxu0 %v7809_v40 }
 0x87c   :  { %6671 = vmatprep.mubr.f32.mxu0 %v7817_v1  ;;  %7068 = vmatpush3.bf16.msra.mxu0 %v7065_v20 }
 0x87d   :  { %7070 = vmatprep.subr.bf16.mxu0 %v7805_v25 }
 0x87f   :  { %6672 = vmatmul.mubr.f32.gmra.mrb[48].mxu0 %v7829_v43 }
 0x880   :  { %6674 = vmatprep.mubr.f32.mxu0 %v7835_v46 }
 0x883   :  { %6675 = vmatmul.mubr.f32.gmra.mrb[50].mxu0 %v4998_v9 }
 0x884   :  { %6685 = vmatprep.mubr.f32.mxu0 %v7768_v38 }
 0x887   :  { %6686 = vmatmul.mubr.f32.vlgmr.msra.gmra.mrb[44].mxu0 %v7798_v28 }
 0x888   :  { %7072 = vmatpush3.bf16.msra.mxu0 %v7805_v25  ;;  %6688 = vmatprep.mubr.f32.mxu0 %v7815_v31 }
 0x889   :  { %7074 = vmatprep.subr.bf16.mxu0 %v7823_v36 }
 0x88b   :  { %6689 = vmatmul.mubr.f32.gmra.mrb[46].mxu0 %v7827_v34 }
 0x88c   :  { %6691 = vmatprep.mubr.f32.mxu0 %v7833_v45  ;;  %7076 = vmatpush3.bf16.msra.mxu0 %v7823_v36 }
 0x88d   :  { %7078 = vmatprep.subr.bf16.mxu0 %v7077_v21 }
 0x88f   :  { %6692 = vmatmul.mubr.f32.gmra.mrb[48].mxu0 %v7845_v48 }
 0x890   :  { %6694 = vmatprep.mubr.f32.mxu0 %v7852_v51 }
 0x893   :  { %6695 = vmatmul.mubr.f32.gmra.mrb[50].mxu0 %v4999_v61 }
 0x894   :  { %6705 = vmatprep.mubr.f32.mxu0 %v4930_v26 }
 0x897   :  { %6706 = vmatmul.mubr.f32.vlgmr.msra.gmra.mrb[44].mxu0 %v4940_v42 }
 0x898   :  { %7080 = vmatpush3.bf16.msra.mxu0 %v7077_v21  ;;  %6708 = vmatprep.mubr.f32.mxu0 %v4950_v37 }
 0x899   :  { %7082 = vmatprep.subr.bf16.mxu0 %v7877_v11 }
 0x89b   :  { %6709 = vmatmul.mubr.f32.gmra.mrb[46].mxu0 %v4960_v47 }
 0x89c   :  { %6711 = vmatprep.mubr.f32.mxu0 %v4970_v50  ;;  %7084 = vmatpush3.bf16.msra.mxu0 %v7877_v11 }
 0x89d   :  { %7086 = vmatprep.subr.bf16.mxu0 %v7805_v25 }
 0x89f   :  { %6712 = vmatmul.mubr.f32.gmra.mrb[48].mxu0 %v4980_v54 }
 0x8a0   :  { %6714 = vmatprep.mubr.f32.mxu0 %v4990_v57 }
 0x8a3   :  { %6715 = vmatmul.mubr.f32.gmra.mrb[50].mxu0 %v5000_v13 }
 0x8a4   :  { %6725 = vmatprep.mubr.f32.mxu0 %v7746_v8 }
 0x8a7   :  { %6726 = vmatmul.mubr.f32.vlgmr.msra.gmra.mrb[44].mxu0 %v7773_v18 }
 0x8a8   :  { %7088 = vmatpush3.bf16.msra.mxu0 %v7805_v25  ;;  %6728 = vmatprep.mubr.f32.mxu0 %v7789_v39 }
 0x8a9   :  { %7090 = vmatprep.subr.bf16.mxu0 %v7823_v36 }
 0x8ab   :  { %6729 = vmatmul.mubr.f32.gmra.mrb[46].mxu0 %v7809_v40 }
 0x8ac   :  { %6731 = vmatprep.mubr.f32.mxu0 %v7817_v1  ;;  %7092 = vmatpush3.bf16.msra.mxu0 %v7823_v36 }
 0x8af   :  { %6732 = vmatmul.mubr.f32.gmra.mrb[48].mxu0 %v7829_v43 }
 0x8b0   :  { %6734 = vmatprep.mubr.f32.mxu0 %v7835_v46 }
 0x8b3   :  { %6735 = vmatmul.mubr.f32.gmra.mrb[50].mxu0 %v4998_v9 }
 0x8b4   :  { %6745 = vmatprep.mubr.f32.mxu0 %v7746_v8 }
 0x8b7   :  { %6746 = vmatmul.mubr.f32.vlgmr.msra.gmra.mrb[44].mxu0 %v7773_v18 }
 0x8b8   :  { %6748 = vmatprep.mubr.f32.mxu0 %v7789_v39 }
 0x8bb   :  { %6749 = vmatmul.mubr.f32.gmra.mrb[46].mxu0 %v7809_v40 }
 0x8bc   :  { %6751 = vmatprep.mubr.f32.mxu0 %v7817_v1 }
 0x8bf   :  { %6752 = vmatmul.mubr.f32.gmra.mrb[48].mxu0 %v7829_v43 }
 0x8c0   :  { %6754 = vmatprep.mubr.f32.mxu0 %v7835_v46 }
 0x8c3   :  { %6755 = vmatmul.mubr.f32.gmra.mrb[50].mxu0 %v4998_v9 }
 0x98a   :  { %v6747_v38 = vpop.f32.mrb[44].mxu0 }
 0x98b   :  { %5647 = vst.msk [vmem:[%s7974_s6 + $0x8] sm:$0xff] %vm5645_vm4, %v6747_v38  ;;  %v5599_v8 = vpop.f32.mrb[45].mxu0 }
 0x98c   :  { %5646 = vst.msk [vmem:[%s7974_s6] sm:$0xff] %vm5645_vm4, %v5599_v8 }
 0x98e   :  { %v6750_v18 = vpop.f32.mrb[46].mxu0 }
 0x98f   :  { %5649 = vst.msk [vmem:[%s7974_s6 + $0x18] sm:$0xff] %vm5645_vm4, %v6750_v18  ;;  %v5611_v26 = vpop.f32.mrb[47].mxu0 }
 0x990   :  { %5648 = vst.msk [vmem:[%s7974_s6 + $0x10] sm:$0xff] %vm5645_vm4, %v5611_v26 }
 0x992   :  { %v6753_v39 = vpop.f32.mrb[48].mxu0 }
 0x993   :  { %5651 = vst.msk [vmem:[%s7974_s6 + $0x28] sm:$0xff] %vm5645_vm4, %v6753_v39  ;;  %v5623_v28 = vpop.f32.mrb[49].mxu0 }
 0x994   :  { %5650 = vst.msk [vmem:[%s7974_s6 + $0x20] sm:$0xff] %vm5645_vm4, %v5623_v28 }
 0x996   :  { %v6756_v25 = vpop.f32.mrb[50].mxu0 }
 0x997   :  { %5653 = vst.msk [vmem:[%s7974_s6 + $0x38] sm:$0xff] %vm5645_vm4, %v6756_v25  ;;  %v5635_v40 = vpop.f32.mrb[51].mxu0 }
 0x998   :  { %5652 = vst.msk [vmem:[%s7974_s6 + $0x30] sm:$0xff] %vm5645_vm4, %v5635_v40 }

</bundles_post_ra>
